<compile_context>
chip_gen: v7x
topology: tpu7x:2x2x1
jax: 0.10.0
libtpu: 0.0.40
codegen_flags: <defaults>
</compile_context>

<pallas_src>
import jax
import jax.numpy as jnp
from jax import lax
from jax.experimental import pallas as pl
from jax.experimental.pallas import tpu as pltpu


def _round_up(x: int, m: int) -> int:
    return ((x + m - 1) // m) * m


# ---------------------------------------------------------------------------
# Pallas kernel (single invocation; all shapes static)
# ---------------------------------------------------------------------------
def _build_kernel(T: int, B_pad: int, L: int, H: int, F_pad: int, offs):
    """offs: dict name -> (row_offset, n_rows) into the packed weight slab."""
    G = 4 * H  # gate width (128 for H=32)

    def kernel(x_ref, hc_ref, w_ref, out_ref):
        f32 = jnp.float32

        def wrows(name):
            o, n = offs[name]
            return w_ref[o:o + n, :]           # static, 8-row-aligned slice

        # Weights (loaded once; all slices are tile-aligned views of the slab).
        wih = [wrows(f"wih{l}")[:, :G] for l in range(L)]      # (in_pad, 4H)
        whh = [wrows(f"whh{l}")[:, :G] for l in range(L)]      # (H, 4H)
        bias = [wrows(f"bias{l}")[0:1, :G] for l in range(L)]  # (1, 4H)
        wp1 = wrows("wp1")                                     # (H, 128)
        bp1 = wrows("bp1")[0:1, :]                             # (1, 128)
        wp2 = wrows("wp2")                                     # (128, 128)
        bp2 = wrows("bp2")[0:1, :]                             # (1, 128)

        # Layer-0 input->hidden GEMM for ALL timesteps at once.
        gates_x0 = jnp.dot(x_ref[...], wih[0],
                           preferred_element_type=f32) + bias[0]   # (T*B_pad, 4H)

        # Register-resident recurrent state (no VMEM scratch).
        h = [hc_ref[(0 * L + l) * B_pad:(0 * L + l + 1) * B_pad, :] for l in range(L)]
        c = [hc_ref[(1 * L + l) * B_pad:(1 * L + l + 1) * B_pad, :] for l in range(L)]
        hs_top = [None] * T

        def cell(l, t, gin):
            # gin: (B_pad, 4H) input contribution, bias already included.
            g = gin + jnp.dot(h[l], whh[l], preferred_element_type=f32)
            sg = jax.nn.sigmoid(g)             # one EUP pass over all 4 gates
            i_g = sg[:, 0 * H:1 * H]
            f_g = sg[:, 1 * H:2 * H]
            o_g = sg[:, 3 * H:4 * H]
            # g-gate weights were pre-scaled by 2, so 2*sigmoid-1 == tanh(pre).
            g_g = 2.0 * sg[:, 2 * H:3 * H] - 1.0
            c[l] = f_g * c[l] + i_g * g_g
            h[l] = o_g * jnp.tanh(c[l])
            if l == L - 1:
                hs_top[t] = h[l]

        # Wavefront over (layer, time): wave w handles (l, t = w - l).  Layers
        # are emitted in decreasing l so layer l reads layer l-1's output for
        # the SAME timestep (produced in the previous wave).
        for w in range(T + L - 1):
            for l in range(L - 1, -1, -1):
                t = w - l
                if not (0 <= t < T):
                    continue
                if l == 0:
                    gin = gates_x0[t * B_pad:(t + 1) * B_pad, :]
                else:
                    gin = jnp.dot(h[l - 1], wih[l],
                                  preferred_element_type=f32) + bias[l]
                cell(l, t, gin)

        # Prediction head once over all timesteps:
        #   Linear(H,64 padded to 128) -> ReLU -> Linear(.,2 padded to 128).
        # The 2-class softmax is pre-folded into wp2/bp2 (sigmoid of logit
        # differences), so no cross-lane reductions or divides are needed.
        hs = jnp.concatenate(hs_top, axis=0)                       # (T*B_pad, H)
        z = jnp.maximum(jnp.dot(hs, wp1, preferred_element_type=f32) + bp1, 0.0)
        logits = jnp.dot(z, wp2, preferred_element_type=f32) + bp2
        out_ref[...] = jax.nn.sigmoid(logits).astype(out_ref.dtype)  # lane-dense

    return kernel


# ---------------------------------------------------------------------------
# Wrapper-side parameter packing
# ---------------------------------------------------------------------------
def _pack_params(F: int, H: int, L: int, lstm_params, pred_params):
    """Pack all weights into one (rows, 128) f32 slab; returns (slab, offsets, F_pad)."""
    G = 4 * H
    C = 128
    assert G <= C and H % 8 == 0, "this script assumes 4*H <= 128 and H % 8 == 0"
    F_pad = _round_up(F, 8)

    wp1_T, bp1, wp2_T, bp2 = pred_params
    P = wp1_T.shape[1]                       # 64
    P_pad = _round_up(P, 128)                # 128
    dtype = jnp.float32

    # Fold 2-class softmax into the final linear:
    #   softmax([a, b]) == sigmoid([a - b, b - a]) == sigmoid(logits @ A).
    A = jnp.array([[1.0, -1.0], [-1.0, 1.0]], dtype=dtype)
    wp2_eff = jnp.pad(wp2_T, ((0, P_pad - P), (0, 0))) @ A       # (P_pad, 2)
    bp2_eff = bp2 @ A                                            # (1, 2)

    blocks = {}

    def add(name, arr):
        r, cc = arr.shape
        arr = jnp.pad(arr, ((0, _round_up(r, 8) - r), (0, C - cc)))
        blocks[name] = arr

    # tanh fold: scale the g-gate columns [2H:3H) of Wih/Whh/bias by 2.
    gscale = jnp.ones((G,), dtype).at[2 * H:3 * H].set(2.0)

    for l in range(L):
        wih_T, whh_T, bih, bhh = lstm_params[l]
        add(f"wih{l}", wih_T * gscale)            # rows auto-padded to 8-multiple
        add(f"whh{l}", whh_T * gscale)
        add(f"bias{l}", (bih + bhh) * gscale)     # pre-summed bias
    add("wp1", jnp.pad(wp1_T, ((0, 0), (0, P_pad - P))))
    add("bp1", jnp.pad(bp1, ((0, 0), (0, P_pad - P))))
    add("wp2", wp2_eff)                           # cols padded to 128 by add()
    add("bp2", bp2_eff)

    offs, parts, row = {}, [], 0
    for name, arr in blocks.items():
        offs[name] = (row, arr.shape[0])
        parts.append(arr)
        row += arr.shape[0]
    slab = jnp.concatenate(parts, axis=0)         # (rows, 128) single DMA
    return slab, offs, F_pad


# ---------------------------------------------------------------------------
# Forward wrapper
# ---------------------------------------------------------------------------
def accident_lstm_forward(inputs, h0, c0, lstm_params, pred_params):
    """inputs: (T, B, F) time-major; h0, c0: (L, B, H).

    lstm_params: list of L tuples (wih_T (F_l,4H), whh_T (H,4H), bih (1,4H), bhh (1,4H))
    pred_params: (wp1_T (H,64), bp1 (1,64), wp2_T (64,2), bp2 (1,2))
    Returns: (T, B, 2) softmax probabilities.
    """
    T, B, F_dim = inputs.shape
    L, _, H = h0.shape
    B_pad = _round_up(B, 8)                  # f32 sublane tile

    slab, offs, F_pad = _pack_params(F_dim, H, L, lstm_params, pred_params)

    # Pad batch (and layer-0 feature dim) with zero rows/cols; padded rows are
    # independent in an LSTM, so real rows are unaffected and get sliced back.
    x = jnp.pad(inputs, ((0, 0), (0, B_pad - B), (0, F_pad - F_dim)))
    x_flat = x.reshape(T * B_pad, F_pad)

    h0_p = jnp.pad(h0, ((0, 0), (0, B_pad - B), (0, 0)))
    c0_p = jnp.pad(c0, ((0, 0), (0, B_pad - B), (0, 0)))
    hc = jnp.stack([h0_p, c0_p], axis=0).reshape(2 * L * B_pad, H)

    kernel = _build_kernel(T, B_pad, L, H, F_pad, offs)

    out_pad = pl.pallas_call(
        kernel,
        out_shape=jax.ShapeDtypeStruct((T * B_pad, 128), jnp.float32),
        in_specs=[pl.BlockSpec(memory_space=pltpu.MemorySpace.VMEM)] * 3,
        out_specs=pl.BlockSpec(memory_space=pltpu.MemorySpace.VMEM),
    )(x_flat, hc, slab)

    return out_pad.reshape(T, B_pad, 128)[:, :B, :2]


# ---------------------------------------------------------------------------
# Pure-JAX reference (mirrors torch.nn.LSTM + pred head semantics)
# ---------------------------------------------------------------------------
def accident_lstm_reference(inputs, h0, c0, lstm_params, pred_params):
    L, _, H = h0.shape
    wp1_T, bp1, wp2_T, bp2 = pred_params

    def step(carry, x_t):
        h, c = carry
        layer_in = x_t
        h_new, c_new = [], []
        for l in range(L):
            wih_T, whh_T, bih, bhh = lstm_params[l]
            gates = layer_in @ wih_T + h[l] @ whh_T + bih + bhh
            i_g = jax.nn.sigmoid(gates[:, 0 * H:1 * H])
            f_g = jax.nn.sigmoid(gates[:, 1 * H:2 * H])
            g_g = jnp.tanh(gates[:, 2 * H:3 * H])
            o_g = jax.nn.sigmoid(gates[:, 3 * H:4 * H])
            c_n = f_g * c[l] + i_g * g_g
            h_n = o_g * jnp.tanh(c_n)
            h_new.append(h_n)
            c_new.append(c_n)
            layer_in = h_n
        return (jnp.stack(h_new), jnp.stack(c_new)), layer_in

    (_, _), outs = lax.scan(step, (h0, c0), inputs)     # outs: (T, B, H)
    z = jax.nn.relu(outs @ wp1_T + bp1)
    logits = z @ wp2_T + bp2
    return jax.nn.softmax(logits, axis=-1)


# ---------------------------------------------------------------------------
# Main
# ---------------------------------------------------------------------------
if __name__ == "__main__":
    # Module hyperparameters (small, consistent with the forward pass).
    temporal_feature = 4     # F
    hidden_feature = 32      # H
    num_layers = 2           # L
    seq_len = 8              # T
    batch = 2                # B

    F, H, L, T, B = temporal_feature, hidden_feature, num_layers, seq_len, batch

    key = jax.random.PRNGKey(0)
    k_in, k_h0, k_c0, k_w = jax.random.split(key, 4)

    inputs = jax.random.normal(k_in, (T, B, F), dtype=jnp.float32)
    h0 = jax.random.normal(k_h0, (L, B, H), dtype=jnp.float32)
    c0 = jax.random.normal(k_c0, (L, B, H), dtype=jnp.float32)

    # Deterministic synthetic parameter init (xavier-ish scale), gate order [i,f,g,o].
    wkeys = jax.random.split(k_w, 4 * L + 4)
    lstm_params = []
    ki = 0
    for l in range(L):
        in_dim = F if l == 0 else H
        wih_T = jax.random.normal(wkeys[ki], (in_dim, 4 * H), jnp.float32) * 0.1; ki += 1
        whh_T = jax.random.normal(wkeys[ki], (H, 4 * H), jnp.float32) * 0.1;      ki += 1
        bih = jax.random.normal(wkeys[ki], (1, 4 * H), jnp.float32) * 0.1;        ki += 1
        bhh = jax.random.normal(wkeys[ki], (1, 4 * H), jnp.float32) * 0.1;        ki += 1
        lstm_params.append((wih_T, whh_T, bih, bhh))

    wp1_T = jax.random.normal(wkeys[ki], (H, 64), jnp.float32) * 0.1; ki += 1
    bp1 = jax.random.normal(wkeys[ki], (1, 64), jnp.float32) * 0.1;   ki += 1
    wp2_T = jax.random.normal(wkeys[ki], (64, 2), jnp.float32) * 0.1; ki += 1
    bp2 = jax.random.normal(wkeys[ki], (1, 2), jnp.float32) * 0.1;    ki += 1
    pred_params = (wp1_T, bp1, wp2_T, bp2)

    out = accident_lstm_forward(inputs, h0, c0, lstm_params, pred_params)
    out = jax.block_until_ready(out)

    ref = accident_lstm_reference(inputs, h0, c0, lstm_params, pred_params)
    ref = jax.block_until_ready(ref)

    assert out.shape == (T, B, 2), out.shape
    assert jnp.allclose(out, ref, rtol=1e-4, atol=1e-5), (
        f"max abs err = {jnp.max(jnp.abs(out - ref))}"
    )
    # Softmax rows sum to 1 (up to f32 rounding of the folded sigmoids).
    assert jnp.allclose(jnp.sum(out, axis=-1), 1.0, atol=1e-4)

    print("KERNEL_OK")
</pallas_src>

<mosaic_0001>
module attributes {stable_mosaic.version = 11 : i64} {
  func.func @kernel(%arg0: memref<64x8xf32, #tpu.memory_space<vmem>>, %arg1: memref<32x32xf32, #tpu.memory_space<vmem>>, %arg2: memref<296x128xf32, #tpu.memory_space<vmem>>, %arg3: memref<64x128xf32, #tpu.memory_space<vmem>>) attributes {dimension_semantics = [], scalar_prefetch = 0 : i64, scratch_operands = 0 : i64, tpu.core_type = #tpu.core_type<tc>} {
    %c0 = arith.constant 0 : index
    %c0_0 = arith.constant 0 : index
    %0 = vector.load %arg2[%c0, %c0_0] : memref<296x128xf32, #tpu.memory_space<vmem>>, vector<8x128xf32>
    %c48 = arith.constant 48 : index
    %c0_1 = arith.constant 0 : index
    %1 = vector.load %arg2[%c48, %c0_1] : memref<296x128xf32, #tpu.memory_space<vmem>>, vector<32x128xf32>
    %c8 = arith.constant 8 : index
    %c0_2 = arith.constant 0 : index
    %2 = vector.load %arg2[%c8, %c0_2] : memref<296x128xf32, #tpu.memory_space<vmem>>, vector<32x128xf32>
    %c80 = arith.constant 80 : index
    %c0_3 = arith.constant 0 : index
    %3 = vector.load %arg2[%c80, %c0_3] : memref<296x128xf32, #tpu.memory_space<vmem>>, vector<32x128xf32>
    %c40 = arith.constant 40 : index
    %c0_4 = arith.constant 0 : index
    %4 = vector.load %arg2[%c40, %c0_4] : memref<296x128xf32, #tpu.memory_space<vmem>>, vector<8x128xf32>
    %5 = vector.extract_strided_slice %4 {offsets = [0, 0], sizes = [1, 128], strides = [1, 1]} : vector<8x128xf32> to vector<1x128xf32>
    %c112 = arith.constant 112 : index
    %c0_5 = arith.constant 0 : index
    %6 = vector.load %arg2[%c112, %c0_5] : memref<296x128xf32, #tpu.memory_space<vmem>>, vector<8x128xf32>
    %7 = vector.extract_strided_slice %6 {offsets = [0, 0], sizes = [1, 128], strides = [1, 1]} : vector<8x128xf32> to vector<1x128xf32>
    %c120 = arith.constant 120 : index
    %c0_6 = arith.constant 0 : index
    %8 = vector.load %arg2[%c120, %c0_6] : memref<296x128xf32, #tpu.memory_space<vmem>>, vector<32x128xf32>
    %c152 = arith.constant 152 : index
    %c0_7 = arith.constant 0 : index
    %9 = vector.load %arg2[%c152, %c0_7] : memref<296x128xf32, #tpu.memory_space<vmem>>, vector<8x128xf32>
    %10 = vector.extract_strided_slice %9 {offsets = [0, 0], sizes = [1, 128], strides = [1, 1]} : vector<8x128xf32> to vector<1x128xf32>
    %c160 = arith.constant 160 : index
    %c0_8 = arith.constant 0 : index
    %11 = vector.load %arg2[%c160, %c0_8] : memref<296x128xf32, #tpu.memory_space<vmem>>, vector<128x128xf32>
    %c288 = arith.constant 288 : index
    %c0_9 = arith.constant 0 : index
    %12 = vector.load %arg2[%c288, %c0_9] : memref<296x128xf32, #tpu.memory_space<vmem>>, vector<8x128xf32>
    %13 = vector.extract_strided_slice %12 {offsets = [0, 0], sizes = [1, 128], strides = [1, 1]} : vector<8x128xf32> to vector<1x128xf32>
    %c0_10 = arith.constant 0 : index
    %c0_11 = arith.constant 0 : index
    %14 = vector.load %arg0[%c0_10, %c0_11] : memref<64x8xf32, #tpu.memory_space<vmem>>, vector<64x8xf32>
    %cst = arith.constant dense<0.000000e+00> : vector<64x128xf32>
    %15 = tpu.matmul %14, %0, %cst {dimension_numbers = #tpu.dot_dimension_numbers<[1], [0], [0], [1], [0, 0, 1, 1], [], []>} : vector<64x8xf32>, vector<8x128xf32>, vector<64x128xf32> -> vector<64x128xf32>
    %16 = vector.broadcast %5 : vector<1x128xf32> to vector<64x128xf32>
    %17 = arith.addf %15, %16 : vector<64x128xf32>
    %c0_12 = arith.constant 0 : index
    %c0_13 = arith.constant 0 : index
    %18 = vector.load %arg1[%c0_12, %c0_13] : memref<32x32xf32, #tpu.memory_space<vmem>>, vector<8x32xf32>
    %c8_14 = arith.constant 8 : index
    %c0_15 = arith.constant 0 : index
    %19 = vector.load %arg1[%c8_14, %c0_15] : memref<32x32xf32, #tpu.memory_space<vmem>>, vector<8x32xf32>
    %c16 = arith.constant 16 : index
    %c0_16 = arith.constant 0 : index
    %20 = vector.load %arg1[%c16, %c0_16] : memref<32x32xf32, #tpu.memory_space<vmem>>, vector<8x32xf32>
    %c24 = arith.constant 24 : index
    %c0_17 = arith.constant 0 : index
    %21 = vector.load %arg1[%c24, %c0_17] : memref<32x32xf32, #tpu.memory_space<vmem>>, vector<8x32xf32>
    %22 = vector.extract_strided_slice %17 {offsets = [0, 0], sizes = [8, 128], strides = [1, 1]} : vector<64x128xf32> to vector<8x128xf32>
    %cst_18 = arith.constant dense<0.000000e+00> : vector<8x128xf32>
    %23 = tpu.matmul %18, %2, %cst_18 {dimension_numbers = #tpu.dot_dimension_numbers<[1], [0], [0], [1], [0, 0, 1, 1], [], []>} : vector<8x32xf32>, vector<32x128xf32>, vector<8x128xf32> -> vector<8x128xf32>
    %24 = arith.addf %22, %23 : vector<8x128xf32>
    %25 = arith.negf %24 : vector<8x128xf32>
    %26 = math.exp %25 : vector<8x128xf32>
    %cst_19 = arith.constant 1.000000e+00 : f32
    %27 = vector.broadcast %cst_19 : f32 to vector<8x128xf32>
    %28 = arith.addf %27, %26 : vector<8x128xf32>
    %29 = arith.divf %27, %28 : vector<8x128xf32>
    %30 = vector.extract_strided_slice %29 {offsets = [0, 0], sizes = [8, 32], strides = [1, 1]} : vector<8x128xf32> to vector<8x32xf32>
    %31 = vector.extract_strided_slice %29 {offsets = [0, 32], sizes = [8, 32], strides = [1, 1]} : vector<8x128xf32> to vector<8x32xf32>
    %32 = vector.extract_strided_slice %29 {offsets = [0, 96], sizes = [8, 32], strides = [1, 1]} : vector<8x128xf32> to vector<8x32xf32>
    %33 = vector.extract_strided_slice %29 {offsets = [0, 64], sizes = [8, 32], strides = [1, 1]} : vector<8x128xf32> to vector<8x32xf32>
    %cst_20 = arith.constant 2.000000e+00 : f32
    %34 = vector.broadcast %cst_20 : f32 to vector<8x32xf32>
    %35 = arith.mulf %34, %33 : vector<8x32xf32>
    %cst_21 = arith.constant 1.000000e+00 : f32
    %36 = vector.broadcast %cst_21 : f32 to vector<8x32xf32>
    %37 = arith.subf %35, %36 : vector<8x32xf32>
    %38 = arith.mulf %31, %20 : vector<8x32xf32>
    %39 = arith.mulf %30, %37 : vector<8x32xf32>
    %40 = arith.addf %38, %39 : vector<8x32xf32>
    %41 = math.tanh %40 : vector<8x32xf32>
    %42 = arith.mulf %32, %41 : vector<8x32xf32>
    %cst_22 = arith.constant dense<0.000000e+00> : vector<8x128xf32>
    %43 = tpu.matmul %42, %1, %cst_22 {dimension_numbers = #tpu.dot_dimension_numbers<[1], [0], [0], [1], [0, 0, 1, 1], [], []>} : vector<8x32xf32>, vector<32x128xf32>, vector<8x128xf32> -> vector<8x128xf32>
    %44 = vector.broadcast %7 : vector<1x128xf32> to vector<8x128xf32>
    %45 = arith.addf %43, %44 : vector<8x128xf32>
    %cst_23 = arith.constant dense<0.000000e+00> : vector<8x128xf32>
    %46 = tpu.matmul %19, %3, %cst_23 {dimension_numbers = #tpu.dot_dimension_numbers<[1], [0], [0], [1], [0, 0, 1, 1], [], []>} : vector<8x32xf32>, vector<32x128xf32>, vector<8x128xf32> -> vector<8x128xf32>
    %47 = arith.addf %45, %46 : vector<8x128xf32>
    %48 = arith.negf %47 : vector<8x128xf32>
    %49 = math.exp %48 : vector<8x128xf32>
    %cst_24 = arith.constant 1.000000e+00 : f32
    %50 = vector.broadcast %cst_24 : f32 to vector<8x128xf32>
    %51 = arith.addf %50, %49 : vector<8x128xf32>
    %52 = arith.divf %50, %51 : vector<8x128xf32>
    %53 = vector.extract_strided_slice %52 {offsets = [0, 0], sizes = [8, 32], strides = [1, 1]} : vector<8x128xf32> to vector<8x32xf32>
    %54 = vector.extract_strided_slice %52 {offsets = [0, 32], sizes = [8, 32], strides = [1, 1]} : vector<8x128xf32> to vector<8x32xf32>
    %55 = vector.extract_strided_slice %52 {offsets = [0, 96], sizes = [8, 32], strides = [1, 1]} : vector<8x128xf32> to vector<8x32xf32>
    %56 = vector.extract_strided_slice %52 {offsets = [0, 64], sizes = [8, 32], strides = [1, 1]} : vector<8x128xf32> to vector<8x32xf32>
    %cst_25 = arith.constant 2.000000e+00 : f32
    %57 = vector.broadcast %cst_25 : f32 to vector<8x32xf32>
    %58 = arith.mulf %57, %56 : vector<8x32xf32>
    %cst_26 = arith.constant 1.000000e+00 : f32
    %59 = vector.broadcast %cst_26 : f32 to vector<8x32xf32>
    %60 = arith.subf %58, %59 : vector<8x32xf32>
    %61 = arith.mulf %54, %21 : vector<8x32xf32>
    %62 = arith.mulf %53, %60 : vector<8x32xf32>
    %63 = arith.addf %61, %62 : vector<8x32xf32>
    %64 = math.tanh %63 : vector<8x32xf32>
    %65 = arith.mulf %55, %64 : vector<8x32xf32>
    %66 = vector.extract_strided_slice %17 {offsets = [8, 0], sizes = [8, 128], strides = [1, 1]} : vector<64x128xf32> to vector<8x128xf32>
    %cst_27 = arith.constant dense<0.000000e+00> : vector<8x128xf32>
    %67 = tpu.matmul %42, %2, %cst_27 {dimension_numbers = #tpu.dot_dimension_numbers<[1], [0], [0], [1], [0, 0, 1, 1], [], []>} : vector<8x32xf32>, vector<32x128xf32>, vector<8x128xf32> -> vector<8x128xf32>
    %68 = arith.addf %66, %67 : vector<8x128xf32>
    %69 = arith.negf %68 : vector<8x128xf32>
    %70 = math.exp %69 : vector<8x128xf32>
    %cst_28 = arith.constant 1.000000e+00 : f32
    %71 = vector.broadcast %cst_28 : f32 to vector<8x128xf32>
    %72 = arith.addf %71, %70 : vector<8x128xf32>
    %73 = arith.divf %71, %72 : vector<8x128xf32>
    %74 = vector.extract_strided_slice %73 {offsets = [0, 0], sizes = [8, 32], strides = [1, 1]} : vector<8x128xf32> to vector<8x32xf32>
    %75 = vector.extract_strided_slice %73 {offsets = [0, 32], sizes = [8, 32], strides = [1, 1]} : vector<8x128xf32> to vector<8x32xf32>
    %76 = vector.extract_strided_slice %73 {offsets = [0, 96], sizes = [8, 32], strides = [1, 1]} : vector<8x128xf32> to vector<8x32xf32>
    %77 = vector.extract_strided_slice %73 {offsets = [0, 64], sizes = [8, 32], strides = [1, 1]} : vector<8x128xf32> to vector<8x32xf32>
    %cst_29 = arith.constant 2.000000e+00 : f32
    %78 = vector.broadcast %cst_29 : f32 to vector<8x32xf32>
    %79 = arith.mulf %78, %77 : vector<8x32xf32>
    %cst_30 = arith.constant 1.000000e+00 : f32
    %80 = vector.broadcast %cst_30 : f32 to vector<8x32xf32>
    %81 = arith.subf %79, %80 : vector<8x32xf32>
    %82 = arith.mulf %75, %40 : vector<8x32xf32>
    %83 = arith.mulf %74, %81 : vector<8x32xf32>
    %84 = arith.addf %82, %83 : vector<8x32xf32>
    %85 = math.tanh %84 : vector<8x32xf32>
    %86 = arith.mulf %76, %85 : vector<8x32xf32>
    %cst_31 = arith.constant dense<0.000000e+00> : vector<8x128xf32>
    %87 = tpu.matmul %86, %1, %cst_31 {dimension_numbers = #tpu.dot_dimension_numbers<[1], [0], [0], [1], [0, 0, 1, 1], [], []>} : vector<8x32xf32>, vector<32x128xf32>, vector<8x128xf32> -> vector<8x128xf32>
    %88 = vector.broadcast %7 : vector<1x128xf32> to vector<8x128xf32>
    %89 = arith.addf %87, %88 : vector<8x128xf32>
    %cst_32 = arith.constant dense<0.000000e+00> : vector<8x128xf32>
    %90 = tpu.matmul %65, %3, %cst_32 {dimension_numbers = #tpu.dot_dimension_numbers<[1], [0], [0], [1], [0, 0, 1, 1], [], []>} : vector<8x32xf32>, vector<32x128xf32>, vector<8x128xf32> -> vector<8x128xf32>
    %91 = arith.addf %89, %90 : vector<8x128xf32>
    %92 = arith.negf %91 : vector<8x128xf32>
    %93 = math.exp %92 : vector<8x128xf32>
    %cst_33 = arith.constant 1.000000e+00 : f32
    %94 = vector.broadcast %cst_33 : f32 to vector<8x128xf32>
    %95 = arith.addf %94, %93 : vector<8x128xf32>
    %96 = arith.divf %94, %95 : vector<8x128xf32>
    %97 = vector.extract_strided_slice %96 {offsets = [0, 0], sizes = [8, 32], strides = [1, 1]} : vector<8x128xf32> to vector<8x32xf32>
    %98 = vector.extract_strided_slice %96 {offsets = [0, 32], sizes = [8, 32], strides = [1, 1]} : vector<8x128xf32> to vector<8x32xf32>
    %99 = vector.extract_strided_slice %96 {offsets = [0, 96], sizes = [8, 32], strides = [1, 1]} : vector<8x128xf32> to vector<8x32xf32>
    %100 = vector.extract_strided_slice %96 {offsets = [0, 64], sizes = [8, 32], strides = [1, 1]} : vector<8x128xf32> to vector<8x32xf32>
    %cst_34 = arith.constant 2.000000e+00 : f32
    %101 = vector.broadcast %cst_34 : f32 to vector<8x32xf32>
    %102 = arith.mulf %101, %100 : vector<8x32xf32>
    %cst_35 = arith.constant 1.000000e+00 : f32
    %103 = vector.broadcast %cst_35 : f32 to vector<8x32xf32>
    %104 = arith.subf %102, %103 : vector<8x32xf32>
    %105 = arith.mulf %98, %63 : vector<8x32xf32>
    %106 = arith.mulf %97, %104 : vector<8x32xf32>
    %107 = arith.addf %105, %106 : vector<8x32xf32>
    %108 = math.tanh %107 : vector<8x32xf32>
    %109 = arith.mulf %99, %108 : vector<8x32xf32>
    %110 = vector.extract_strided_slice %17 {offsets = [16, 0], sizes = [8, 128], strides = [1, 1]} : vector<64x128xf32> to vector<8x128xf32>
    %cst_36 = arith.constant dense<0.000000e+00> : vector<8x128xf32>
    %111 = tpu.matmul %86, %2, %cst_36 {dimension_numbers = #tpu.dot_dimension_numbers<[1], [0], [0], [1], [0, 0, 1, 1], [], []>} : vector<8x32xf32>, vector<32x128xf32>, vector<8x128xf32> -> vector<8x128xf32>
    %112 = arith.addf %110, %111 : vector<8x128xf32>
    %113 = arith.negf %112 : vector<8x128xf32>
    %114 = math.exp %113 : vector<8x128xf32>
    %cst_37 = arith.constant 1.000000e+00 : f32
    %115 = vector.broadcast %cst_37 : f32 to vector<8x128xf32>
    %116 = arith.addf %115, %114 : vector<8x128xf32>
    %117 = arith.divf %115, %116 : vector<8x128xf32>
    %118 = vector.extract_strided_slice %117 {offsets = [0, 0], sizes = [8, 32], strides = [1, 1]} : vector<8x128xf32> to vector<8x32xf32>
    %119 = vector.extract_strided_slice %117 {offsets = [0, 32], sizes = [8, 32], strides = [1, 1]} : vector<8x128xf32> to vector<8x32xf32>
    %120 = vector.extract_strided_slice %117 {offsets = [0, 96], sizes = [8, 32], strides = [1, 1]} : vector<8x128xf32> to vector<8x32xf32>
    %121 = vector.extract_strided_slice %117 {offsets = [0, 64], sizes = [8, 32], strides = [1, 1]} : vector<8x128xf32> to vector<8x32xf32>
    %cst_38 = arith.constant 2.000000e+00 : f32
    %122 = vector.broadcast %cst_38 : f32 to vector<8x32xf32>
    %123 = arith.mulf %122, %121 : vector<8x32xf32>
    %cst_39 = arith.constant 1.000000e+00 : f32
    %124 = vector.broadcast %cst_39 : f32 to vector<8x32xf32>
    %125 = arith.subf %123, %124 : vector<8x32xf32>
    %126 = arith.mulf %119, %84 : vector<8x32xf32>
    %127 = arith.mulf %118, %125 : vector<8x32xf32>
    %128 = arith.addf %126, %127 : vector<8x32xf32>
    %129 = math.tanh %128 : vector<8x32xf32>
    %130 = arith.mulf %120, %129 : vector<8x32xf32>
    %cst_40 = arith.constant dense<0.000000e+00> : vector<8x128xf32>
    %131 = tpu.matmul %130, %1, %cst_40 {dimension_numbers = #tpu.dot_dimension_numbers<[1], [0], [0], [1], [0, 0, 1, 1], [], []>} : vector<8x32xf32>, vector<32x128xf32>, vector<8x128xf32> -> vector<8x128xf32>
    %132 = vector.broadcast %7 : vector<1x128xf32> to vector<8x128xf32>
    %133 = arith.addf %131, %132 : vector<8x128xf32>
    %cst_41 = arith.constant dense<0.000000e+00> : vector<8x128xf32>
    %134 = tpu.matmul %109, %3, %cst_41 {dimension_numbers = #tpu.dot_dimension_numbers<[1], [0], [0], [1], [0, 0, 1, 1], [], []>} : vector<8x32xf32>, vector<32x128xf32>, vector<8x128xf32> -> vector<8x128xf32>
    %135 = arith.addf %133, %134 : vector<8x128xf32>
    %136 = arith.negf %135 : vector<8x128xf32>
    %137 = math.exp %136 : vector<8x128xf32>
    %cst_42 = arith.constant 1.000000e+00 : f32
    %138 = vector.broadcast %cst_42 : f32 to vector<8x128xf32>
    %139 = arith.addf %138, %137 : vector<8x128xf32>
    %140 = arith.divf %138, %139 : vector<8x128xf32>
    %141 = vector.extract_strided_slice %140 {offsets = [0, 0], sizes = [8, 32], strides = [1, 1]} : vector<8x128xf32> to vector<8x32xf32>
    %142 = vector.extract_strided_slice %140 {offsets = [0, 32], sizes = [8, 32], strides = [1, 1]} : vector<8x128xf32> to vector<8x32xf32>
    %143 = vector.extract_strided_slice %140 {offsets = [0, 96], sizes = [8, 32], strides = [1, 1]} : vector<8x128xf32> to vector<8x32xf32>
    %144 = vector.extract_strided_slice %140 {offsets = [0, 64], sizes = [8, 32], strides = [1, 1]} : vector<8x128xf32> to vector<8x32xf32>
    %cst_43 = arith.constant 2.000000e+00 : f32
    %145 = vector.broadcast %cst_43 : f32 to vector<8x32xf32>
    %146 = arith.mulf %145, %144 : vector<8x32xf32>
    %cst_44 = arith.constant 1.000000e+00 : f32
    %147 = vector.broadcast %cst_44 : f32 to vector<8x32xf32>
    %148 = arith.subf %146, %147 : vector<8x32xf32>
    %149 = arith.mulf %142, %107 : vector<8x32xf32>
    %150 = arith.mulf %141, %148 : vector<8x32xf32>
    %151 = arith.addf %149, %150 : vector<8x32xf32>
    %152 = math.tanh %151 : vector<8x32xf32>
    %153 = arith.mulf %143, %152 : vector<8x32xf32>
    %154 = vector.extract_strided_slice %17 {offsets = [24, 0], sizes = [8, 128], strides = [1, 1]} : vector<64x128xf32> to vector<8x128xf32>
    %cst_45 = arith.constant dense<0.000000e+00> : vector<8x128xf32>
    %155 = tpu.matmul %130, %2, %cst_45 {dimension_numbers = #tpu.dot_dimension_numbers<[1], [0], [0], [1], [0, 0, 1, 1], [], []>} : vector<8x32xf32>, vector<32x128xf32>, vector<8x128xf32> -> vector<8x128xf32>
    %156 = arith.addf %154, %155 : vector<8x128xf32>
    %157 = arith.negf %156 : vector<8x128xf32>
    %158 = math.exp %157 : vector<8x128xf32>
    %cst_46 = arith.constant 1.000000e+00 : f32
    %159 = vector.broadcast %cst_46 : f32 to vector<8x128xf32>
    %160 = arith.addf %159, %158 : vector<8x128xf32>
    %161 = arith.divf %159, %160 : vector<8x128xf32>
    %162 = vector.extract_strided_slice %161 {offsets = [0, 0], sizes = [8, 32], strides = [1, 1]} : vector<8x128xf32> to vector<8x32xf32>
    %163 = vector.extract_strided_slice %161 {offsets = [0, 32], sizes = [8, 32], strides = [1, 1]} : vector<8x128xf32> to vector<8x32xf32>
    %164 = vector.extract_strided_slice %161 {offsets = [0, 96], sizes = [8, 32], strides = [1, 1]} : vector<8x128xf32> to vector<8x32xf32>
    %165 = vector.extract_strided_slice %161 {offsets = [0, 64], sizes = [8, 32], strides = [1, 1]} : vector<8x128xf32> to vector<8x32xf32>
    %cst_47 = arith.constant 2.000000e+00 : f32
    %166 = vector.broadcast %cst_47 : f32 to vector<8x32xf32>
    %167 = arith.mulf %166, %165 : vector<8x32xf32>
    %cst_48 = arith.constant 1.000000e+00 : f32
    %168 = vector.broadcast %cst_48 : f32 to vector<8x32xf32>
    %169 = arith.subf %167, %168 : vector<8x32xf32>
    %170 = arith.mulf %163, %128 : vector<8x32xf32>
    %171 = arith.mulf %162, %169 : vector<8x32xf32>
    %172 = arith.addf %170, %171 : vector<8x32xf32>
    %173 = math.tanh %172 : vector<8x32xf32>
    %174 = arith.mulf %164, %173 : vector<8x32xf32>
    %cst_49 = arith.constant dense<0.000000e+00> : vector<8x128xf32>
    %175 = tpu.matmul %174, %1, %cst_49 {dimension_numbers = #tpu.dot_dimension_numbers<[1], [0], [0], [1], [0, 0, 1, 1], [], []>} : vector<8x32xf32>, vector<32x128xf32>, vector<8x128xf32> -> vector<8x128xf32>
    %176 = vector.broadcast %7 : vector<1x128xf32> to vector<8x128xf32>
    %177 = arith.addf %175, %176 : vector<8x128xf32>
    %cst_50 = arith.constant dense<0.000000e+00> : vector<8x128xf32>
    %178 = tpu.matmul %153, %3, %cst_50 {dimension_numbers = #tpu.dot_dimension_numbers<[1], [0], [0], [1], [0, 0, 1, 1], [], []>} : vector<8x32xf32>, vector<32x128xf32>, vector<8x128xf32> -> vector<8x128xf32>
    %179 = arith.addf %177, %178 : vector<8x128xf32>
    %180 = arith.negf %179 : vector<8x128xf32>
    %181 = math.exp %180 : vector<8x128xf32>
    %cst_51 = arith.constant 1.000000e+00 : f32
    %182 = vector.broadcast %cst_51 : f32 to vector<8x128xf32>
    %183 = arith.addf %182, %181 : vector<8x128xf32>
    %184 = arith.divf %182, %183 : vector<8x128xf32>
    %185 = vector.extract_strided_slice %184 {offsets = [0, 0], sizes = [8, 32], strides = [1, 1]} : vector<8x128xf32> to vector<8x32xf32>
    %186 = vector.extract_strided_slice %184 {offsets = [0, 32], sizes = [8, 32], strides = [1, 1]} : vector<8x128xf32> to vector<8x32xf32>
    %187 = vector.extract_strided_slice %184 {offsets = [0, 96], sizes = [8, 32], strides = [1, 1]} : vector<8x128xf32> to vector<8x32xf32>
    %188 = vector.extract_strided_slice %184 {offsets = [0, 64], sizes = [8, 32], strides = [1, 1]} : vector<8x128xf32> to vector<8x32xf32>
    %cst_52 = arith.constant 2.000000e+00 : f32
    %189 = vector.broadcast %cst_52 : f32 to vector<8x32xf32>
    %190 = arith.mulf %189, %188 : vector<8x32xf32>
    %cst_53 = arith.constant 1.000000e+00 : f32
    %191 = vector.broadcast %cst_53 : f32 to vector<8x32xf32>
    %192 = arith.subf %190, %191 : vector<8x32xf32>
    %193 = arith.mulf %186, %151 : vector<8x32xf32>
    %194 = arith.mulf %185, %192 : vector<8x32xf32>
    %195 = arith.addf %193, %194 : vector<8x32xf32>
    %196 = math.tanh %195 : vector<8x32xf32>
    %197 = arith.mulf %187, %196 : vector<8x32xf32>
    %198 = vector.extract_strided_slice %17 {offsets = [32, 0], sizes = [8, 128], strides = [1, 1]} : vector<64x128xf32> to vector<8x128xf32>
    %cst_54 = arith.constant dense<0.000000e+00> : vector<8x128xf32>
    %199 = tpu.matmul %174, %2, %cst_54 {dimension_numbers = #tpu.dot_dimension_numbers<[1], [0], [0], [1], [0, 0, 1, 1], [], []>} : vector<8x32xf32>, vector<32x128xf32>, vector<8x128xf32> -> vector<8x128xf32>
    %200 = arith.addf %198, %199 : vector<8x128xf32>
    %201 = arith.negf %200 : vector<8x128xf32>
    %202 = math.exp %201 : vector<8x128xf32>
    %cst_55 = arith.constant 1.000000e+00 : f32
    %203 = vector.broadcast %cst_55 : f32 to vector<8x128xf32>
    %204 = arith.addf %203, %202 : vector<8x128xf32>
    %205 = arith.divf %203, %204 : vector<8x128xf32>
    %206 = vector.extract_strided_slice %205 {offsets = [0, 0], sizes = [8, 32], strides = [1, 1]} : vector<8x128xf32> to vector<8x32xf32>
    %207 = vector.extract_strided_slice %205 {offsets = [0, 32], sizes = [8, 32], strides = [1, 1]} : vector<8x128xf32> to vector<8x32xf32>
    %208 = vector.extract_strided_slice %205 {offsets = [0, 96], sizes = [8, 32], strides = [1, 1]} : vector<8x128xf32> to vector<8x32xf32>
    %209 = vector.extract_strided_slice %205 {offsets = [0, 64], sizes = [8, 32], strides = [1, 1]} : vector<8x128xf32> to vector<8x32xf32>
    %cst_56 = arith.constant 2.000000e+00 : f32
    %210 = vector.broadcast %cst_56 : f32 to vector<8x32xf32>
    %211 = arith.mulf %210, %209 : vector<8x32xf32>
    %cst_57 = arith.constant 1.000000e+00 : f32
    %212 = vector.broadcast %cst_57 : f32 to vector<8x32xf32>
    %213 = arith.subf %211, %212 : vector<8x32xf32>
    %214 = arith.mulf %207, %172 : vector<8x32xf32>
    %215 = arith.mulf %206, %213 : vector<8x32xf32>
    %216 = arith.addf %214, %215 : vector<8x32xf32>
    %217 = math.tanh %216 : vector<8x32xf32>
    %218 = arith.mulf %208, %217 : vector<8x32xf32>
    %cst_58 = arith.constant dense<0.000000e+00> : vector<8x128xf32>
    %219 = tpu.matmul %218, %1, %cst_58 {dimension_numbers = #tpu.dot_dimension_numbers<[1], [0], [0], [1], [0, 0, 1, 1], [], []>} : vector<8x32xf32>, vector<32x128xf32>, vector<8x128xf32> -> vector<8x128xf32>
    %220 = vector.broadcast %7 : vector<1x128xf32> to vector<8x128xf32>
    %221 = arith.addf %219, %220 : vector<8x128xf32>
    %cst_59 = arith.constant dense<0.000000e+00> : vector<8x128xf32>
    %222 = tpu.matmul %197, %3, %cst_59 {dimension_numbers = #tpu.dot_dimension_numbers<[1], [0], [0], [1], [0, 0, 1, 1], [], []>} : vector<8x32xf32>, vector<32x128xf32>, vector<8x128xf32> -> vector<8x128xf32>
    %223 = arith.addf %221, %222 : vector<8x128xf32>
    %224 = arith.negf %223 : vector<8x128xf32>
    %225 = math.exp %224 : vector<8x128xf32>
    %cst_60 = arith.constant 1.000000e+00 : f32
    %226 = vector.broadcast %cst_60 : f32 to vector<8x128xf32>
    %227 = arith.addf %226, %225 : vector<8x128xf32>
    %228 = arith.divf %226, %227 : vector<8x128xf32>
    %229 = vector.extract_strided_slice %228 {offsets = [0, 0], sizes = [8, 32], strides = [1, 1]} : vector<8x128xf32> to vector<8x32xf32>
    %230 = vector.extract_strided_slice %228 {offsets = [0, 32], sizes = [8, 32], strides = [1, 1]} : vector<8x128xf32> to vector<8x32xf32>
    %231 = vector.extract_strided_slice %228 {offsets = [0, 96], sizes = [8, 32], strides = [1, 1]} : vector<8x128xf32> to vector<8x32xf32>
    %232 = vector.extract_strided_slice %228 {offsets = [0, 64], sizes = [8, 32], strides = [1, 1]} : vector<8x128xf32> to vector<8x32xf32>
    %cst_61 = arith.constant 2.000000e+00 : f32
    %233 = vector.broadcast %cst_61 : f32 to vector<8x32xf32>
    %234 = arith.mulf %233, %232 : vector<8x32xf32>
    %cst_62 = arith.constant 1.000000e+00 : f32
    %235 = vector.broadcast %cst_62 : f32 to vector<8x32xf32>
    %236 = arith.subf %234, %235 : vector<8x32xf32>
    %237 = arith.mulf %230, %195 : vector<8x32xf32>
    %238 = arith.mulf %229, %236 : vector<8x32xf32>
    %239 = arith.addf %237, %238 : vector<8x32xf32>
    %240 = math.tanh %239 : vector<8x32xf32>
    %241 = arith.mulf %231, %240 : vector<8x32xf32>
    %242 = vector.extract_strided_slice %17 {offsets = [40, 0], sizes = [8, 128], strides = [1, 1]} : vector<64x128xf32> to vector<8x128xf32>
    %cst_63 = arith.constant dense<0.000000e+00> : vector<8x128xf32>
    %243 = tpu.matmul %218, %2, %cst_63 {dimension_numbers = #tpu.dot_dimension_numbers<[1], [0], [0], [1], [0, 0, 1, 1], [], []>} : vector<8x32xf32>, vector<32x128xf32>, vector<8x128xf32> -> vector<8x128xf32>
    %244 = arith.addf %242, %243 : vector<8x128xf32>
    %245 = arith.negf %244 : vector<8x128xf32>
    %246 = math.exp %245 : vector<8x128xf32>
    %cst_64 = arith.constant 1.000000e+00 : f32
    %247 = vector.broadcast %cst_64 : f32 to vector<8x128xf32>
    %248 = arith.addf %247, %246 : vector<8x128xf32>
    %249 = arith.divf %247, %248 : vector<8x128xf32>
    %250 = vector.extract_strided_slice %249 {offsets = [0, 0], sizes = [8, 32], strides = [1, 1]} : vector<8x128xf32> to vector<8x32xf32>
    %251 = vector.extract_strided_slice %249 {offsets = [0, 32], sizes = [8, 32], strides = [1, 1]} : vector<8x128xf32> to vector<8x32xf32>
    %252 = vector.extract_strided_slice %249 {offsets = [0, 96], sizes = [8, 32], strides = [1, 1]} : vector<8x128xf32> to vector<8x32xf32>
    %253 = vector.extract_strided_slice %249 {offsets = [0, 64], sizes = [8, 32], strides = [1, 1]} : vector<8x128xf32> to vector<8x32xf32>
    %cst_65 = arith.constant 2.000000e+00 : f32
    %254 = vector.broadcast %cst_65 : f32 to vector<8x32xf32>
    %255 = arith.mulf %254, %253 : vector<8x32xf32>
    %cst_66 = arith.constant 1.000000e+00 : f32
    %256 = vector.broadcast %cst_66 : f32 to vector<8x32xf32>
    %257 = arith.subf %255, %256 : vector<8x32xf32>
    %258 = arith.mulf %251, %216 : vector<8x32xf32>
    %259 = arith.mulf %250, %257 : vector<8x32xf32>
    %260 = arith.addf %258, %259 : vector<8x32xf32>
    %261 = math.tanh %260 : vector<8x32xf32>
    %262 = arith.mulf %252, %261 : vector<8x32xf32>
    %cst_67 = arith.constant dense<0.000000e+00> : vector<8x128xf32>
    %263 = tpu.matmul %262, %1, %cst_67 {dimension_numbers = #tpu.dot_dimension_numbers<[1], [0], [0], [1], [0, 0, 1, 1], [], []>} : vector<8x32xf32>, vector<32x128xf32>, vector<8x128xf32> -> vector<8x128xf32>
    %264 = vector.broadcast %7 : vector<1x128xf32> to vector<8x128xf32>
    %265 = arith.addf %263, %264 : vector<8x128xf32>
    %cst_68 = arith.constant dense<0.000000e+00> : vector<8x128xf32>
    %266 = tpu.matmul %241, %3, %cst_68 {dimension_numbers = #tpu.dot_dimension_numbers<[1], [0], [0], [1], [0, 0, 1, 1], [], []>} : vector<8x32xf32>, vector<32x128xf32>, vector<8x128xf32> -> vector<8x128xf32>
    %267 = arith.addf %265, %266 : vector<8x128xf32>
    %268 = arith.negf %267 : vector<8x128xf32>
    %269 = math.exp %268 : vector<8x128xf32>
    %cst_69 = arith.constant 1.000000e+00 : f32
    %270 = vector.broadcast %cst_69 : f32 to vector<8x128xf32>
    %271 = arith.addf %270, %269 : vector<8x128xf32>
    %272 = arith.divf %270, %271 : vector<8x128xf32>
    %273 = vector.extract_strided_slice %272 {offsets = [0, 0], sizes = [8, 32], strides = [1, 1]} : vector<8x128xf32> to vector<8x32xf32>
    %274 = vector.extract_strided_slice %272 {offsets = [0, 32], sizes = [8, 32], strides = [1, 1]} : vector<8x128xf32> to vector<8x32xf32>
    %275 = vector.extract_strided_slice %272 {offsets = [0, 96], sizes = [8, 32], strides = [1, 1]} : vector<8x128xf32> to vector<8x32xf32>
    %276 = vector.extract_strided_slice %272 {offsets = [0, 64], sizes = [8, 32], strides = [1, 1]} : vector<8x128xf32> to vector<8x32xf32>
    %cst_70 = arith.constant 2.000000e+00 : f32
    %277 = vector.broadcast %cst_70 : f32 to vector<8x32xf32>
    %278 = arith.mulf %277, %276 : vector<8x32xf32>
    %cst_71 = arith.constant 1.000000e+00 : f32
    %279 = vector.broadcast %cst_71 : f32 to vector<8x32xf32>
    %280 = arith.subf %278, %279 : vector<8x32xf32>
    %281 = arith.mulf %274, %239 : vector<8x32xf32>
    %282 = arith.mulf %273, %280 : vector<8x32xf32>
    %283 = arith.addf %281, %282 : vector<8x32xf32>
    %284 = math.tanh %283 : vector<8x32xf32>
    %285 = arith.mulf %275, %284 : vector<8x32xf32>
    %286 = vector.extract_strided_slice %17 {offsets = [48, 0], sizes = [8, 128], strides = [1, 1]} : vector<64x128xf32> to vector<8x128xf32>
    %cst_72 = arith.constant dense<0.000000e+00> : vector<8x128xf32>
    %287 = tpu.matmul %262, %2, %cst_72 {dimension_numbers = #tpu.dot_dimension_numbers<[1], [0], [0], [1], [0, 0, 1, 1], [], []>} : vector<8x32xf32>, vector<32x128xf32>, vector<8x128xf32> -> vector<8x128xf32>
    %288 = arith.addf %286, %287 : vector<8x128xf32>
    %289 = arith.negf %288 : vector<8x128xf32>
    %290 = math.exp %289 : vector<8x128xf32>
    %cst_73 = arith.constant 1.000000e+00 : f32
    %291 = vector.broadcast %cst_73 : f32 to vector<8x128xf32>
    %292 = arith.addf %291, %290 : vector<8x128xf32>
    %293 = arith.divf %291, %292 : vector<8x128xf32>
    %294 = vector.extract_strided_slice %293 {offsets = [0, 0], sizes = [8, 32], strides = [1, 1]} : vector<8x128xf32> to vector<8x32xf32>
    %295 = vector.extract_strided_slice %293 {offsets = [0, 32], sizes = [8, 32], strides = [1, 1]} : vector<8x128xf32> to vector<8x32xf32>
    %296 = vector.extract_strided_slice %293 {offsets = [0, 96], sizes = [8, 32], strides = [1, 1]} : vector<8x128xf32> to vector<8x32xf32>
    %297 = vector.extract_strided_slice %293 {offsets = [0, 64], sizes = [8, 32], strides = [1, 1]} : vector<8x128xf32> to vector<8x32xf32>
    %cst_74 = arith.constant 2.000000e+00 : f32
    %298 = vector.broadcast %cst_74 : f32 to vector<8x32xf32>
    %299 = arith.mulf %298, %297 : vector<8x32xf32>
    %cst_75 = arith.constant 1.000000e+00 : f32
    %300 = vector.broadcast %cst_75 : f32 to vector<8x32xf32>
    %301 = arith.subf %299, %300 : vector<8x32xf32>
    %302 = arith.mulf %295, %260 : vector<8x32xf32>
    %303 = arith.mulf %294, %301 : vector<8x32xf32>
    %304 = arith.addf %302, %303 : vector<8x32xf32>
    %305 = math.tanh %304 : vector<8x32xf32>
    %306 = arith.mulf %296, %305 : vector<8x32xf32>
    %cst_76 = arith.constant dense<0.000000e+00> : vector<8x128xf32>
    %307 = tpu.matmul %306, %1, %cst_76 {dimension_numbers = #tpu.dot_dimension_numbers<[1], [0], [0], [1], [0, 0, 1, 1], [], []>} : vector<8x32xf32>, vector<32x128xf32>, vector<8x128xf32> -> vector<8x128xf32>
    %308 = vector.broadcast %7 : vector<1x128xf32> to vector<8x128xf32>
    %309 = arith.addf %307, %308 : vector<8x128xf32>
    %cst_77 = arith.constant dense<0.000000e+00> : vector<8x128xf32>
    %310 = tpu.matmul %285, %3, %cst_77 {dimension_numbers = #tpu.dot_dimension_numbers<[1], [0], [0], [1], [0, 0, 1, 1], [], []>} : vector<8x32xf32>, vector<32x128xf32>, vector<8x128xf32> -> vector<8x128xf32>
    %311 = arith.addf %309, %310 : vector<8x128xf32>
    %312 = arith.negf %311 : vector<8x128xf32>
    %313 = math.exp %312 : vector<8x128xf32>
    %cst_78 = arith.constant 1.000000e+00 : f32
    %314 = vector.broadcast %cst_78 : f32 to vector<8x128xf32>
    %315 = arith.addf %314, %313 : vector<8x128xf32>
    %316 = arith.divf %314, %315 : vector<8x128xf32>
    %317 = vector.extract_strided_slice %316 {offsets = [0, 0], sizes = [8, 32], strides = [1, 1]} : vector<8x128xf32> to vector<8x32xf32>
    %318 = vector.extract_strided_slice %316 {offsets = [0, 32], sizes = [8, 32], strides = [1, 1]} : vector<8x128xf32> to vector<8x32xf32>
    %319 = vector.extract_strided_slice %316 {offsets = [0, 96], sizes = [8, 32], strides = [1, 1]} : vector<8x128xf32> to vector<8x32xf32>
    %320 = vector.extract_strided_slice %316 {offsets = [0, 64], sizes = [8, 32], strides = [1, 1]} : vector<8x128xf32> to vector<8x32xf32>
    %cst_79 = arith.constant 2.000000e+00 : f32
    %321 = vector.broadcast %cst_79 : f32 to vector<8x32xf32>
    %322 = arith.mulf %321, %320 : vector<8x32xf32>
    %cst_80 = arith.constant 1.000000e+00 : f32
    %323 = vector.broadcast %cst_80 : f32 to vector<8x32xf32>
    %324 = arith.subf %322, %323 : vector<8x32xf32>
    %325 = arith.mulf %318, %283 : vector<8x32xf32>
    %326 = arith.mulf %317, %324 : vector<8x32xf32>
    %327 = arith.addf %325, %326 : vector<8x32xf32>
    %328 = math.tanh %327 : vector<8x32xf32>
    %329 = arith.mulf %319, %328 : vector<8x32xf32>
    %330 = vector.extract_strided_slice %17 {offsets = [56, 0], sizes = [8, 128], strides = [1, 1]} : vector<64x128xf32> to vector<8x128xf32>
    %cst_81 = arith.constant dense<0.000000e+00> : vector<8x128xf32>
    %331 = tpu.matmul %306, %2, %cst_81 {dimension_numbers = #tpu.dot_dimension_numbers<[1], [0], [0], [1], [0, 0, 1, 1], [], []>} : vector<8x32xf32>, vector<32x128xf32>, vector<8x128xf32> -> vector<8x128xf32>
    %332 = arith.addf %330, %331 : vector<8x128xf32>
    %333 = arith.negf %332 : vector<8x128xf32>
    %334 = math.exp %333 : vector<8x128xf32>
    %cst_82 = arith.constant 1.000000e+00 : f32
    %335 = vector.broadcast %cst_82 : f32 to vector<8x128xf32>
    %336 = arith.addf %335, %334 : vector<8x128xf32>
    %337 = arith.divf %335, %336 : vector<8x128xf32>
    %338 = vector.extract_strided_slice %337 {offsets = [0, 0], sizes = [8, 32], strides = [1, 1]} : vector<8x128xf32> to vector<8x32xf32>
    %339 = vector.extract_strided_slice %337 {offsets = [0, 32], sizes = [8, 32], strides = [1, 1]} : vector<8x128xf32> to vector<8x32xf32>
    %340 = vector.extract_strided_slice %337 {offsets = [0, 96], sizes = [8, 32], strides = [1, 1]} : vector<8x128xf32> to vector<8x32xf32>
    %341 = vector.extract_strided_slice %337 {offsets = [0, 64], sizes = [8, 32], strides = [1, 1]} : vector<8x128xf32> to vector<8x32xf32>
    %cst_83 = arith.constant 2.000000e+00 : f32
    %342 = vector.broadcast %cst_83 : f32 to vector<8x32xf32>
    %343 = arith.mulf %342, %341 : vector<8x32xf32>
    %cst_84 = arith.constant 1.000000e+00 : f32
    %344 = vector.broadcast %cst_84 : f32 to vector<8x32xf32>
    %345 = arith.subf %343, %344 : vector<8x32xf32>
    %346 = arith.mulf %339, %304 : vector<8x32xf32>
    %347 = arith.mulf %338, %345 : vector<8x32xf32>
    %348 = arith.addf %346, %347 : vector<8x32xf32>
    %349 = math.tanh %348 : vector<8x32xf32>
    %350 = arith.mulf %340, %349 : vector<8x32xf32>
    %cst_85 = arith.constant dense<0.000000e+00> : vector<8x128xf32>
    %351 = tpu.matmul %350, %1, %cst_85 {dimension_numbers = #tpu.dot_dimension_numbers<[1], [0], [0], [1], [0, 0, 1, 1], [], []>} : vector<8x32xf32>, vector<32x128xf32>, vector<8x128xf32> -> vector<8x128xf32>
    %352 = vector.broadcast %7 : vector<1x128xf32> to vector<8x128xf32>
    %353 = arith.addf %351, %352 : vector<8x128xf32>
    %cst_86 = arith.constant dense<0.000000e+00> : vector<8x128xf32>
    %354 = tpu.matmul %329, %3, %cst_86 {dimension_numbers = #tpu.dot_dimension_numbers<[1], [0], [0], [1], [0, 0, 1, 1], [], []>} : vector<8x32xf32>, vector<32x128xf32>, vector<8x128xf32> -> vector<8x128xf32>
    %355 = arith.addf %353, %354 : vector<8x128xf32>
    %356 = arith.negf %355 : vector<8x128xf32>
    %357 = math.exp %356 : vector<8x128xf32>
    %cst_87 = arith.constant 1.000000e+00 : f32
    %358 = vector.broadcast %cst_87 : f32 to vector<8x128xf32>
    %359 = arith.addf %358, %357 : vector<8x128xf32>
    %360 = arith.divf %358, %359 : vector<8x128xf32>
    %361 = vector.extract_strided_slice %360 {offsets = [0, 0], sizes = [8, 32], strides = [1, 1]} : vector<8x128xf32> to vector<8x32xf32>
    %362 = vector.extract_strided_slice %360 {offsets = [0, 32], sizes = [8, 32], strides = [1, 1]} : vector<8x128xf32> to vector<8x32xf32>
    %363 = vector.extract_strided_slice %360 {offsets = [0, 96], sizes = [8, 32], strides = [1, 1]} : vector<8x128xf32> to vector<8x32xf32>
    %364 = vector.extract_strided_slice %360 {offsets = [0, 64], sizes = [8, 32], strides = [1, 1]} : vector<8x128xf32> to vector<8x32xf32>
    %cst_88 = arith.constant 2.000000e+00 : f32
    %365 = vector.broadcast %cst_88 : f32 to vector<8x32xf32>
    %366 = arith.mulf %365, %364 : vector<8x32xf32>
    %cst_89 = arith.constant 1.000000e+00 : f32
    %367 = vector.broadcast %cst_89 : f32 to vector<8x32xf32>
    %368 = arith.subf %366, %367 : vector<8x32xf32>
    %369 = arith.mulf %362, %327 : vector<8x32xf32>
    %370 = arith.mulf %361, %368 : vector<8x32xf32>
    %371 = arith.addf %369, %370 : vector<8x32xf32>
    %372 = math.tanh %371 : vector<8x32xf32>
    %373 = arith.mulf %363, %372 : vector<8x32xf32>
    %374 = tpu.concatenate %65, %109, %153, %197, %241, %285, %329, %373 in 0 : vector<8x32xf32>, vector<8x32xf32>, vector<8x32xf32>, vector<8x32xf32>, vector<8x32xf32>, vector<8x32xf32>, vector<8x32xf32>, vector<8x32xf32> -> vector<64x32xf32>
    %cst_90 = arith.constant dense<0.000000e+00> : vector<64x128xf32>
    %375 = tpu.matmul %374, %8, %cst_90 {dimension_numbers = #tpu.dot_dimension_numbers<[1], [0], [0], [1], [0, 0, 1, 1], [], []>} : vector<64x32xf32>, vector<32x128xf32>, vector<64x128xf32> -> vector<64x128xf32>
    %376 = vector.broadcast %10 : vector<1x128xf32> to vector<64x128xf32>
    %377 = arith.addf %375, %376 : vector<64x128xf32>
    %cst_91 = arith.constant 0.000000e+00 : f32
    %378 = vector.broadcast %cst_91 : f32 to vector<64x128xf32>
    %379 = arith.maximumf %377, %378 : vector<64x128xf32>
    %cst_92 = arith.constant dense<0.000000e+00> : vector<64x128xf32>
    %380 = tpu.matmul %379, %11, %cst_92 {dimension_numbers = #tpu.dot_dimension_numbers<[1], [0], [0], [1], [0, 0, 1, 1], [], []>} : vector<64x128xf32>, vector<128x128xf32>, vector<64x128xf32> -> vector<64x128xf32>
    %381 = vector.broadcast %13 : vector<1x128xf32> to vector<64x128xf32>
    %382 = arith.addf %380, %381 : vector<64x128xf32>
    %383 = arith.negf %382 : vector<64x128xf32>
    %384 = math.exp %383 : vector<64x128xf32>
    %cst_93 = arith.constant 1.000000e+00 : f32
    %385 = vector.broadcast %cst_93 : f32 to vector<64x128xf32>
    %386 = arith.addf %385, %384 : vector<64x128xf32>
    %387 = arith.divf %385, %386 : vector<64x128xf32>
    %c0_94 = arith.constant 0 : index
    %c0_95 = arith.constant 0 : index
    %388 = vector.load %arg3[%c0_94, %c0_95] : memref<64x128xf32, #tpu.memory_space<vmem>>, vector<64x128xf32>
    tpu.vector_store %arg3[%c0_94, %c0_95], %387 {strides = array<i32>} : memref<64x128xf32, #tpu.memory_space<vmem>>, vector<64x128xf32>,
    return
  }
}

</mosaic_0001>

<bundles_post_ra>
// kernel: tpu_custom_call.1
= control target key start
LH: loop header
LB: loop body
LE: loop exit
PB: predicated region body
PF: predicated region fallthrough
CT: control target
= control target key end

     0   :  { %8 = vsyncpa [#allocation3], 0  ;;  %s4192_s0 = inlined_call_operand.vmem [shape: f32[64,8], index: 0, kind: input, shape index: {}]   ;;  %s4193_s1 = inlined_call_operand.vmem [shape: f32[32,32], index: 1, kind: input, shape index: {}]   ;;  %s4194_s2 = inlined_call_operand.hbm [shape: f32[296,128], index: 2, kind: input, shape index: {}]   ;;  %s4195_s3 = inlined_call_operand.hbm [shape: f32[64,128], index: 3, kind: output, shape index: {}]  }
   0x1   :  { %9 = vsyncpa [#allocation4], 0  ;;  %s3688_s12 = smov [#allocation2]   ;;  %s3640_s16 = scalar_lea.hbm %s4194_s2, 4736 }
   0x2   :  { %s19_s13 = sshll.u32 %s3688_s12, 4  ;;  %p3641_p0 = scmp.ne.s32.totalorder %s4194_s2, %s3640_s16  ;;  %s20_s13 = int_to_ptr.vmem [resolvable:$true] %s19_s13 }
   0x3   :  { %p3644_p1 = scmp.lt.u32.totalorder %s3640_s16, %s4194_s2 }
   0x5   :  { %p3646_p2 = pnand %p3644_p1, %p3641_p0 }
   0x7   :  { %3649 = shalt.err (!%p3646_p2)
}
   0x8   :  { %s3650_s21 = scalar_lea.vmem %s20_s13, 4736  ;;  %p3655_p4 = scmp.lt.s32.totalorder %s20_s13, %s20_s13 }
   0x9   :  { %p3651_p3 = scmp.ne.s32.totalorder %s20_s13, %s3650_s21  ;;  %p3656_p5 = scmp.lt.s32.totalorder %s3650_s21, %s3650_s21 }
   0xb   :  { %p3657_p6 = por %p3656_p5, %p3655_p4 }
   0xd   :  { %p3658_p7 = pnand %p3657_p6, %p3651_p3 }
   0xf   :  { %3661 = shalt.err (!%p3658_p7)
}
  0x10   :  { %s3689_s22 = smov 128   ;;  %s3690_s23 = smov 8  }
  0x11   :  { %25 = dma.hbm_to_vmem [thread:$0]  %s4194_s2, 4736, %s20_s13, [#allocation3], %s3689_s22, %s3689_s22, %s3690_s23  }
  0x12   :  { %3684 = dma.done.wait [#allocation3], 4736  }
  0x13   :  { %3685 = vsyncadd [#allocation3], 4294962560  ;;  %vm78_vm0 = vcmask 64512   ;;  %v29_v0 = vld [vmem:[#allocation2] sm:$0xff]  ;;  %v67_v2 = vld [vmem:[%s4192_s0 + $0x8] sm:$0xff]  ;;  %v3691_v9 = vmov 0.0|0.0   ;;  %v74_v14 = vlaneseq }
  0x14   :  { %v66_v1 = vld [vmem:[%s4192_s0] sm:$0xff]  ;;  %2951 = vmatprep.subr.mxu0 %v29_v0  ;;  %v34_v3 = vld [vmem:[#allocation2 + $0x8] sm:$0xff]  ;;  %v35_v4 = vld [vmem:[#allocation2 + $0x10] sm:$0xff]  ;;  %3477 = vmatprep.subr.mxu1 %v29_v0  ;;  %vm3692_vm1 = vmmov 0   ;;  %v3693_v12 = vmov 0.0   ;;  %vm212_vm2 = vcmask 261120  }
  0x15   :  { %2953 = vmatprep.mubr.msk.f32.mxu0 %vm78_vm0, %v66_v1  ;;  %v68_v5 = vld [vmem:[%s4192_s0 + $0x10] sm:$0xff]  ;;  %2952 = vmatpush3.msra.mxu0 %v29_v0  ;;  %v3742_v6 = vpack.c.bf16 %v35_v4, %v34_v3  ;;  %v36_v7 = vld [vmem:[#allocation2 + $0x18] sm:$0xff]  ;;  %v37_v8 = vld [vmem:[#allocation2 + $0x20] sm:$0xff]  ;;  %v75_v15 = vshrl.u32 %v74_v14, 7  ;;  %s3694_s8 = smov 64   ;;  %s3695_s11 = smov 32  }
  0x16   :  { %2954 = vmatmul.mubr.msk.f32.vlgmr.msra.gmra.mrb[0].mxu0 %vm78_vm0, %v67_v2  ;;  %3293 = vmatprep.subr.bf16.mxu0 %v3691_v9  ;;  %v69_v10 = vld [vmem:[%s4192_s0 + $0x18] sm:$0xff]  ;;  %v3751_v11 = vpack.c.bf16 %v37_v8, %v36_v7  ;;  %v208_v13 = vld [vmem:[%s4193_s1] sm:$0xff]  ;;  %v42_v17 = vld [vmem:[#allocation2 + $0x28] sm:$0xff] }
  0x17   :  { %3295 = vmatpush3.bf16.msra.mxu0 %v3742_v6  ;;  %2956 = vmatprep.mubr.msk.f32.mxu0 %vm78_vm0, %v68_v5  ;;  %v3766_v16 = vsub.s32 0, %v75_v15  ;;  %v210_v33 = vld [vmem:[%s4193_s1 + $0x10] sm:$0xff]  ;;  %v31_v41 = vld [vmem:[#allocation2 + $0x38] sm:$0xff]  ;;  %v32_v42 = vld [vmem:[#allocation2 + $0x40] sm:$0xff] }
  0x18   :  { %3296 = vmatprep.subr.bf16.mxu0 %v3691_v9  ;;  %3478 = vmatpush3.msra.mxu1 %v29_v0  ;;  %v30_v40 = vld [vmem:[#allocation2 + $0x30] sm:$0xff]  ;;  %v33_v44 = vld [vmem:[#allocation2 + $0x48] sm:$0xff]  ;;  %v39_v50 = vld [vmem:[#allocation2 + $0x58] sm:$0xff] }
  0x19   :  { %3329 = vmatprep.subr.bf16.mxu1 %v3691_v9  ;;  %v3771_v20 = vrot.slane %v42_v17, %v3766_v16  ;;  %v3787_v43 = vpack.c.bf16 %v31_v41, %v30_v40  ;;  %v3790_v45 = vpack.c.bf16 %v33_v44, %v32_v42  ;;  %v38_v49 = vld [vmem:[#allocation2 + $0x50] sm:$0xff]  ;;  %v40_v52 = vld [vmem:[#allocation2 + $0x60] sm:$0xff]  ;;  %v41_v53 = vld [vmem:[#allocation2 + $0x68] sm:$0xff] }
  0x1a   :  { %2957 = vmatmul.mubr.msk.f32.gmra.mrb[2].mxu0 %vm78_vm0, %v69_v10  ;;  %v3797_v51 = vpack.c.bf16 %v39_v50, %v38_v49  ;;  %v3801_v55 = vpack.c.bf16 %v41_v53, %v40_v52  ;;  %v209_v56 = vld [vmem:[%s4193_s1 + $0x8] sm:$0xff]  ;;  %v43_v57 = vld [vmem:[#allocation2 + $0x70] sm:$0xff]  ;;  %v211_v15 = vld [vmem:[%s4193_s1 + $0x18] sm:$0xff] }
  0x1b   :  { %3298 = vmatpush3.bf16.msra.mxu0 %v3751_v11  ;;  %2973 = vmatprep.mubr.msk.f32.mxu0 %vm3692_vm1, %v3693_v12  ;;  %v3826_v58 = vrot.slane %v43_v57, %v3766_v16 }
  0x1c   :  { %3299 = vmatprep.subr.bf16.mxu0 %v3691_v9 }
  0x1e   :  { %2974 = vmatmul.mubr.msk.f32.vlgmr.msra.gmra.mrb[4].mxu0 %vm212_vm2, %v208_v13 }
  0x1f   :  { %2984 = vmatprep.mubr.msk.f32.mxu0 %vm3692_vm1, %v3693_v12  ;;  %3301 = vmatpush3.bf16.msra.mxu0 %v3787_v43 }
  0x20   :  { %3302 = vmatprep.subr.bf16.mxu0 %v3691_v9 }
  0x23   :  { %3304 = vmatpush3.bf16.msra.mxu0 %v3790_v45 }
  0x24   :  { %3305 = vmatprep.subr.bf16.mxu0 %v3691_v9 }
  0xe9   :  { %v3768_v18 = vpop.f32.mrb[0].mxu0 }
  0xea   :  { %v169_v19 = vpop.f32.mrb[1].mxu0  ;;  %v175_v63 = vadd.f32 %v3768_v18, %v3771_v20 }
  0xeb   :  { %v170_v23 = vadd.f32 %v169_v19, %v3771_v20 }
  0xed   :  { %v3773_v21 = vpop.f32.mrb[2].mxu0 }
  0xee   :  { %v3775_v22 = vpop.f32.mrb[3].mxu0 }
  0xef   :  { %v180_v53 = vadd.f32 %v3775_v22, %v3771_v20 }
  0xf1   :  { %v282_v24 = vpop.f32.mrb[4].mxu0 }
  0xf2   :  { %v286_v25 = vadd.f32 %v282_v24, %v170_v23  ;;  %v2975_v26 = vpop.f32.mrb[5].mxu0 }
  0xf4   :  { %v2715_v27 = vmul.f32 -1.442695, %v286_v25 }
  0xf6   :  { %3512 = vpow2.f32 %v2715_v27 }
 0x100   :  { %v3513_v28 = vpop.eup %3512 }
 0x101   :  { %v290_v29 = vadd.f32 1.0, %v3513_v28 }
 0x103   :  { %3514 = vrcp.f32 %v290_v29 }
 0x10d   :  { %v3515_v30 = vpop.eup %3514 }
 0x10e   :  { %v293_v31 = vmul.f32 2.0, %v3515_v30 }
 0x110   :  { %v2716_v32 = vadd.f32 -1.0, %v293_v31 }
 0x112   :  { %301 = vrot.lane.b32.xlu0 %v2716_v32, %s3694_s8 }
 0x116   :  { %296 = vrot.lane.b32.xlu0 %v210_v33, %s3695_s11 }
 0x184   :  { %v302_v34 = vpop.permute.xlu0 %301 }
 0x185   :  { %v304_v35 = vmul.f32 %v3515_v30, %v302_v34  ;;  %v70_v34 = vld [vmem:[%s4192_s0 + $0x20] sm:$0xff] }
 0x186   :  { %2959 = vmatprep.mubr.msk.f32.mxu1 %vm78_vm0, %v70_v34 }
 0x187   :  { %306 = vrot.lane.b32.xlu1 %v304_v35, %s3695_s11  ;;  %v71_v35 = vld [vmem:[%s4192_s0 + $0x28] sm:$0xff] }
 0x188   :  { %v297_v36 = vpop.permute.xlu0 %296  ;;  %2960 = vmatmul.mubr.msk.f32.vlgmr.msra.gmra.mrb[0].mxu1 %vm78_vm0, %v71_v35  ;;  %v185_v35 = vadd.f32 %v3773_v21, %v3771_v20 }
 0x189   :  { %v299_v37 = vmul.f32 %v3515_v30, %v297_v36  ;;  %v72_v36 = vld [vmem:[%s4192_s0 + $0x30] sm:$0xff]  ;;  %3331 = vmatpush3.bf16.msra.mxu1 %v3742_v6 }
 0x18a   :  { %2962 = vmatprep.mubr.msk.f32.mxu1 %vm78_vm0, %v72_v36  ;;  %3332 = vmatprep.subr.bf16.mxu1 %v3691_v9 }
 0x18d   :  { %3334 = vmatpush3.bf16.msra.mxu1 %v3751_v11 }
 0x18e   :  { %3335 = vmatprep.subr.bf16.mxu1 %v3691_v9 }
 0x1f9   :  { %v307_v38 = vpop.permute.xlu1 %306 }
 0x1fa   :  { %v3784_v39 = vadd.f32 %v307_v38, %v299_v37  ;;  %v73_v37 = vld [vmem:[%s4192_s0 + $0x38] sm:$0xff]  ;;  %s3696_s0 = smov [#allocation5]  }
 0x1fb   :  { %2963 = vmatmul.mubr.msk.f32.gmra.mrb[2].mxu1 %vm78_vm0, %v73_v37  ;;  %s2694_s25 = sshll.u32 %s3696_s0, 4  ;;  %s2695_s25 = int_to_ptr.vmem [resolvable:$true] %s2694_s25 }
 0x1fc   :  { %3516 = vtanh.f32 %v3784_v39  ;;  %3039 = vmatprep.mubr.msk.f32.mxu1 %vm3692_vm1, %v3693_v12  ;;  %s3662_s26 = scalar_lea.vmem %s2695_s25, 1024  ;;  %p3667_p9 = scmp.lt.s32.totalorder %s2695_s25, %s2695_s25 }
 0x1fd   :  { %p3663_p8 = scmp.ne.s32.totalorder %s2695_s25, %s3662_s26  ;;  %p3668_p10 = scmp.lt.s32.totalorder %s3662_s26, %s3662_s26 }
 0x1ff   :  { %p3669_p11 = por %p3668_p10, %p3667_p9 }
 0x201   :  { %p3670_p12 = pnand %p3669_p11, %p3663_p8 }
 0x206   :  { %v3517_v46 = vpop.eup %3516 }
 0x207   :  { %312 = vrot.lane.b32.xlu1 %v3517_v46, %s3694_s8 }
 0x25b   :  { %v3872_v46 = vpop.f32.mrb[0].mxu1 }
 0x279   :  { %v313_v47 = vpop.permute.xlu1 %312 }
 0x27a   :  { %v315_v48 = vmul.f32 %v3515_v30, %v313_v47  ;;  %v3874_v47 = vpop.f32.mrb[1].mxu1 }
 0x27c   :  { %321 = vrot.lane.b32.xlu0 %v315_v48, %s3695_s11 }
 0x2ce   :  { %v3876_v48 = vpop.f32.mrb[2].mxu1 }
 0x2cf   :  { %v3878_v49 = vpop.f32.mrb[3].mxu1 }
 0x2ee   :  { %v322_v54 = vpop.permute.xlu0 %321 }
 0x2ef   :  { %2985 = vmatmul.mubr.msk.f32.vlgmr.msra.gmra.mrb[6].mxu0 %vm212_vm2, %v322_v54 }
 0x2f0   :  { %3307 = vmatpush3.bf16.msra.mxu0 %v3797_v51  ;;  %2995 = vmatprep.mubr.msk.f32.mxu0 %vm3692_vm1, %v3693_v12 }
 0x2f1   :  { %3308 = vmatprep.subr.bf16.mxu0 %v3691_v9 }
 0x2f4   :  { %3310 = vmatpush3.bf16.msra.mxu0 %v3801_v55 }
 0x2f5   :  { %3311 = vmatprep.subr.bf16.mxu0 %v3691_v9 }
 0x2f7   :  { %2996 = vmatmul.mubr.msk.f32.vlgmr.msra.gmra.mrb[6].mxu0 %vm212_vm2, %v209_v56 }
 0x2f8   :  { %3313 = vmatpush3.bf16.msra.mxu0 %v3742_v6  ;;  %3006 = vmatprep.mubr.msk.f32.mxu0 %vm3692_vm1, %v3693_v12 }
 0x2f9   :  { %3314 = vmatprep.subr.bf16.mxu0 %v3691_v9 }
 0x2fc   :  { %3316 = vmatpush3.bf16.msra.mxu0 %v3751_v11 }
 0x2fd   :  { %3317 = vmatprep.subr.bf16.mxu0 %v3691_v9 }
 0x2ff   :  { %3007 = vmatmul.mubr.msk.f32.vlgmr.msra.gmra.mrb[8].mxu0 %vm212_vm2, %v322_v54 }
 0x300   :  { %3319 = vmatpush3.bf16.msra.mxu0 %v3787_v43  ;;  %3017 = vmatprep.mubr.msk.f32.mxu0 %vm3692_vm1, %v3693_v12 }
 0x301   :  { %3320 = vmatprep.subr.bf16.mxu0 %v3691_v9 }
 0x304   :  { %3322 = vmatpush3.bf16.msra.mxu0 %v3790_v45 }
 0x305   :  { %3323 = vmatprep.subr.bf16.mxu0 %v3691_v9 }
 0x3ca   :  { %v464_v59 = vpop.f32.mrb[6].mxu0 }
 0x3cb   :  { %v3479_v60 = vadd.f32 %v464_v59, %v3826_v58  ;;  %v2997_v61 = vpop.f32.mrb[7].mxu0 }
 0x3cd   :  { %v2719_v62 = vmul.f32 -1.442695, %v3479_v60 }
 0x3cf   :  { %3518 = vpow2.f32 %v2719_v62 }
 0x3d2   :  { %v564_v0 = vpop.f32.mrb[8].mxu0 }
 0x3d3   :  { %v568_v1 = vadd.f32 %v564_v0, %v175_v63  ;;  %v3008_v2 = vpop.f32.mrb[9].mxu0 }
 0x3d5   :  { %v2722_v3 = vmul.f32 -1.442695, %v568_v1 }
 0x3d7   :  { %3520 = vpow2.f32 %v2722_v3 }
 0x3d9   :  { %v3519_v4 = vpop.eup %3518 }
 0x3da   :  { %v472_v5 = vadd.f32 1.0, %v3519_v4 }
 0x3dc   :  { %3522 = vrcp.f32 %v472_v5 }
 0x3e1   :  { %v3521_v7 = vpop.eup %3520 }
 0x3e2   :  { %v572_v8 = vadd.f32 1.0, %v3521_v7 }
 0x3e4   :  { %3524 = vrcp.f32 %v572_v8 }
 0x3e6   :  { %v3523_v10 = vpop.eup %3522 }
 0x3e7   :  { %v475_v13 = vmul.f32 2.0, %v3523_v10 }
 0x3e9   :  { %v2720_v14 = vadd.f32 -1.0, %v475_v13 }
 0x3eb   :  { %483 = vrot.lane.b32.xlu0 %v2720_v14, %s3694_s8 }
 0x3ee   :  { %v3525_v17 = vpop.eup %3524 }
 0x3ef   :  { %478 = vrot.lane.b32.xlu0 %v211_v15, %s3695_s11  ;;  %v575_v18 = vmul.f32 2.0, %v3525_v17  ;;  %v577_v27 = vmul.f32 %v3525_v17, %v3784_v39 }
 0x3f1   :  { %v2723_v19 = vadd.f32 -1.0, %v575_v18 }
 0x3f3   :  { %579 = vrot.lane.b32.xlu1 %v2723_v19, %s3694_s8 }
 0x45d   :  { %v484_v25 = vpop.permute.xlu0 %483 }
 0x45e   :  { %v486_v26 = vmul.f32 %v3523_v10, %v484_v25 }
 0x461   :  { %v479_v28 = vpop.permute.xlu0 %478 }
 0x462   :  { %v481_v31 = vmul.f32 %v3523_v10, %v479_v28 }
 0x465   :  { %v580_v23 = vpop.permute.xlu1 %579 }
 0x466   :  { %v582_v24 = vmul.f32 %v3525_v17, %v580_v23 }
 0x468   :  { %584 = vrot.lane.b32.xlu1 %v582_v24, %s3695_s11 }
 0x46c   :  { %488 = vrot.lane.b32.xlu1 %v486_v26, %s3695_s11 }
 0x4da   :  { %v585_v29 = vpop.permute.xlu1 %584 }
 0x4db   :  { %v3840_v30 = vadd.f32 %v585_v29, %v577_v27 }
 0x4dd   :  { %3526 = vtanh.f32 %v3840_v30 }
 0x4de   :  { %v489_v32 = vpop.permute.xlu1 %488 }
 0x4df   :  { %v3843_v33 = vadd.f32 %v489_v32, %v481_v31 }
 0x4e1   :  { %3528 = vtanh.f32 %v3843_v33 }
 0x4e7   :  { %v3527_v38 = vpop.eup %3526 }
 0x4e8   :  { %590 = vrot.lane.b32.xlu0 %v3527_v38, %s3694_s8 }
 0x4eb   :  { %v3529_v39 = vpop.eup %3528 }
 0x4ec   :  { %494 = vrot.lane.b32.xlu1 %v3529_v39, %s3694_s8 }
 0x55a   :  { %v591_v40 = vpop.permute.xlu0 %590 }
 0x55b   :  { %v593_v41 = vmul.f32 %v3525_v17, %v591_v40 }
 0x55d   :  { %595 = vrot.lane.b32.xlu0 %v593_v41, %s3695_s11 }
 0x55e   :  { %v495_v42 = vpop.permute.xlu1 %494 }
 0x55f   :  { %v497_v44 = vmul.f32 %v3523_v10, %v495_v42 }
 0x561   :  { %670 = vrot.lane.b32.xlu1 %v497_v44, %s3695_s11 }
 0x5cf   :  { %v596_v50 = vpop.permute.xlu0 %595 }
 0x5d0   :  { %3018 = vmatmul.mubr.msk.f32.vlgmr.msra.gmra.mrb[10].mxu0 %vm212_vm2, %v596_v50  ;;  %3040 = vmatmul.mubr.msk.f32.vlgmr.msra.gmra.mrb[4].mxu1 %vm212_vm2, %v596_v50 }
 0x5d1   :  { %3325 = vmatpush3.bf16.msra.mxu0 %v3797_v51  ;;  %3028 = vmatprep.mubr.msk.f32.mxu0 %vm3692_vm1, %v3693_v12 }
 0x5d2   :  { %3326 = vmatprep.subr.bf16.mxu0 %v3691_v9  ;;  %3337 = vmatpush3.bf16.msra.mxu1 %v3787_v43 }
 0x5d3   :  { %3338 = vmatprep.subr.bf16.mxu1 %v3691_v9  ;;  %3050 = vmatprep.mubr.msk.f32.mxu1 %vm3692_vm1, %v3693_v12  ;;  %v3893_v52 = vpop.permute.xlu1 %670 }
 0x5d5   :  { %3328 = vmatpush3.bf16.msra.mxu0 %v3801_v55 }
 0x5d6   :  { %3347 = vmatprep.subr.bf16.mxu0 %v3691_v9  ;;  %3340 = vmatpush3.bf16.msra.mxu1 %v3790_v45 }
 0x5d7   :  { %3341 = vmatprep.subr.bf16.mxu1 %v3691_v9 }
 0x5d8   :  { %3029 = vmatmul.mubr.msk.f32.vlgmr.msra.gmra.mrb[10].mxu0 %vm212_vm2, %v3893_v52 }
 0x5d9   :  { %3349 = vmatpush3.bf16.msra.mxu0 %v3742_v6  ;;  %3072 = vmatprep.mubr.msk.f32.mxu0 %vm3692_vm1, %v3693_v12 }
 0x5da   :  { %3350 = vmatprep.subr.bf16.mxu0 %v3691_v9 }
 0x5dd   :  { %3352 = vmatpush3.bf16.msra.mxu0 %v3751_v11 }
 0x5de   :  { %3353 = vmatprep.subr.bf16.mxu0 %v3691_v9 }
 0x6a3   :  { %v836_v54 = vpop.f32.mrb[4].mxu1 }
 0x6a4   :  { %v840_v56 = vadd.f32 %v836_v54, %v180_v53  ;;  %v3041_v57 = vpop.f32.mrb[5].mxu1 }
 0x6a6   :  { %v2729_v59 = vmul.f32 -1.442695, %v840_v56 }
 0x6a8   :  { %3530 = vpow2.f32 %v2729_v59 }
 0x6ab   :  { %v740_v60 = vpop.f32.mrb[10].mxu0 }
 0x6ac   :  { %v3480_v61 = vadd.f32 %v740_v60, %v3826_v58  ;;  %v3030_v62 = vpop.f32.mrb[11].mxu0 }
 0x6ae   :  { %v2726_v63 = vmul.f32 -1.442695, %v3480_v61 }
 0x6b0   :  { %3532 = vpow2.f32 %v2726_v63 }
 0x6b2   :  { %v3531_v0 = vpop.eup %3530 }
 0x6b3   :  { %v844_v1 = vadd.f32 1.0, %v3531_v0 }
 0x6b5   :  { %3534 = vrcp.f32 %v844_v1 }
 0x6ba   :  { %v3533_v2 = vpop.eup %3532 }
 0x6bb   :  { %v748_v3 = vadd.f32 1.0, %v3533_v2 }
 0x6bd   :  { %3536 = vrcp.f32 %v748_v3 }
 0x6bf   :  { %v3535_v4 = vpop.eup %3534 }
 0x6c0   :  { %v847_v5 = vmul.f32 2.0, %v3535_v4  ;;  %v849_v18 = vmul.f32 %v3535_v4, %v3840_v30 }
 0x6c2   :  { %v2730_v22 = vadd.f32 -1.0, %v847_v5 }
 0x6c4   :  { %851 = vrot.lane.b32.xlu0 %v2730_v22, %s3694_s8 }
 0x6c7   :  { %v3537_v7 = vpop.eup %3536 }
 0x6c8   :  { %v751_v8 = vmul.f32 2.0, %v3537_v7  ;;  %v753_v24 = vmul.f32 %v3537_v7, %v3843_v33 }
 0x6ca   :  { %v2727_v10 = vadd.f32 -1.0, %v751_v8 }
 0x6cc   :  { %755 = vrot.lane.b32.xlu1 %v2727_v10, %s3694_s8 }
 0x736   :  { %v852_v13 = vpop.permute.xlu0 %851 }
 0x737   :  { %v854_v14 = vmul.f32 %v3535_v4, %v852_v13 }
 0x739   :  { %856 = vrot.lane.b32.xlu0 %v854_v14, %s3695_s11 }
 0x73e   :  { %v756_v15 = vpop.permute.xlu1 %755 }
 0x73f   :  { %v758_v17 = vmul.f32 %v3537_v7, %v756_v15 }
 0x741   :  { %760 = vrot.lane.b32.xlu1 %v758_v17, %s3695_s11 }
 0x7ab   :  { %v857_v19 = vpop.permute.xlu0 %856 }
 0x7ac   :  { %v3912_v23 = vadd.f32 %v857_v19, %v849_v18 }
 0x7ae   :  { %3538 = vtanh.f32 %v3912_v23 }
 0x7b3   :  { %v761_v25 = vpop.permute.xlu1 %760 }
 0x7b4   :  { %v3916_v26 = vadd.f32 %v761_v25, %v753_v24  ;;  %v190_v24 = vadd.f32 %v3874_v47, %v3771_v20 }
 0x7b6   :  { %3540 = vtanh.f32 %v3916_v26 }
 0x7b8   :  { %v3539_v27 = vpop.eup %3538 }
 0x7b9   :  { %862 = vrot.lane.b32.xlu0 %v3539_v27, %s3694_s8 }
 0x7c0   :  { %v3541_v28 = vpop.eup %3540 }
 0x7c1   :  { %766 = vrot.lane.b32.xlu1 %v3541_v28, %s3694_s8 }
 0x82b   :  { %v863_v29 = vpop.permute.xlu0 %862 }
 0x82c   :  { %v865_v30 = vmul.f32 %v3535_v4, %v863_v29 }
 0x82e   :  { %867 = vrot.lane.b32.xlu0 %v865_v30, %s3695_s11 }
 0x833   :  { %v767_v31 = vpop.permute.xlu1 %766 }
 0x834   :  { %v769_v32 = vmul.f32 %v3537_v7, %v767_v31 }
 0x836   :  { %942 = vrot.lane.b32.xlu1 %v769_v32, %s3695_s11 }
 0x8a0   :  { %v868_v33 = vpop.permute.xlu0 %867 }
 0x8a1   :  { %3051 = vmatmul.mubr.msk.f32.vlgmr.msra.gmra.mrb[6].mxu1 %vm212_vm2, %v868_v33  ;;  %3073 = vmatmul.mubr.msk.f32.vlgmr.msra.gmra.mrb[12].mxu0 %vm212_vm2, %v868_v33 }
 0x8a2   :  { %3343 = vmatpush3.bf16.msra.mxu1 %v3797_v51  ;;  %3061 = vmatprep.mubr.msk.f32.mxu1 %vm3692_vm1, %v3693_v12 }
 0x8a3   :  { %3344 = vmatprep.subr.bf16.mxu1 %v3691_v9  ;;  %3355 = vmatpush3.bf16.msra.mxu0 %v3787_v43 }
 0x8a4   :  { %3356 = vmatprep.subr.bf16.mxu0 %v3691_v9  ;;  %3083 = vmatprep.mubr.msk.f32.mxu0 %vm3692_vm1, %v3693_v12 }
 0x8a6   :  { %3346 = vmatpush3.bf16.msra.mxu1 %v3801_v55 }
 0x8a7   :  { %3365 = vmatprep.subr.bf16.mxu1 %v3691_v9  ;;  %3358 = vmatpush3.bf16.msra.mxu0 %v3790_v45 }
 0x8a8   :  { %v3936_v34 = vpop.permute.xlu1 %942  ;;  %3359 = vmatprep.subr.bf16.mxu0 %v3691_v9 }
 0x8a9   :  { %3062 = vmatmul.mubr.msk.f32.vlgmr.msra.gmra.mrb[6].mxu1 %vm212_vm2, %v3936_v34 }
 0x8aa   :  { %3367 = vmatpush3.bf16.msra.mxu1 %v3742_v6  ;;  %3105 = vmatprep.mubr.msk.f32.mxu1 %vm3692_vm1, %v3693_v12 }
 0x8ab   :  { %3368 = vmatprep.subr.bf16.mxu1 %v3691_v9 }
 0x8ae   :  { %3370 = vmatpush3.bf16.msra.mxu1 %v3751_v11 }
 0x8af   :  { %3371 = vmatprep.subr.bf16.mxu1 %v3691_v9 }
 0x974   :  { %v1108_v36 = vpop.f32.mrb[12].mxu0 }
 0x975   :  { %v1112_v37 = vadd.f32 %v1108_v36, %v185_v35  ;;  %v3074_v38 = vpop.f32.mrb[13].mxu0 }
 0x977   :  { %v2736_v39 = vmul.f32 -1.442695, %v1112_v37 }
 0x979   :  { %3542 = vpow2.f32 %v2736_v39 }
 0x97c   :  { %v1012_v40 = vpop.f32.mrb[6].mxu1 }
 0x97d   :  { %v3481_v41 = vadd.f32 %v1012_v40, %v3826_v58  ;;  %v3063_v42 = vpop.f32.mrb[7].mxu1 }
 0x97f   :  { %v2733_v44 = vmul.f32 -1.442695, %v3481_v41 }
 0x981   :  { %3544 = vpow2.f32 %v2733_v44 }
 0x983   :  { %v3543_v50 = vpop.eup %3542 }
 0x984   :  { %v1116_v53 = vadd.f32 1.0, %v3543_v50 }
 0x986   :  { %3546 = vrcp.f32 %v1116_v53 }
 0x98b   :  { %v3545_v54 = vpop.eup %3544 }
 0x98c   :  { %v1020_v56 = vadd.f32 1.0, %v3545_v54 }
 0x98e   :  { %3548 = vrcp.f32 %v1020_v56 }
 0x990   :  { %v3547_v57 = vpop.eup %3546 }
 0x991   :  { %v1119_v59 = vmul.f32 2.0, %v3547_v57  ;;  %v1121_v3 = vmul.f32 %v3547_v57, %v3912_v23 }
 0x993   :  { %v2737_v21 = vadd.f32 -1.0, %v1119_v59 }
 0x995   :  { %1123 = vrot.lane.b32.xlu0 %v2737_v21, %s3694_s8 }
 0x998   :  { %v3549_v60 = vpop.eup %3548 }
 0x999   :  { %v1023_v61 = vmul.f32 2.0, %v3549_v60  ;;  %v1025_v22 = vmul.f32 %v3549_v60, %v3916_v26 }
 0x99b   :  { %v2734_v62 = vadd.f32 -1.0, %v1023_v61 }
 0x99d   :  { %1027 = vrot.lane.b32.xlu1 %v2734_v62, %s3694_s8 }
 0xa07   :  { %v1124_v63 = vpop.permute.xlu0 %1123 }
 0xa08   :  { %v1126_v0 = vmul.f32 %v3547_v57, %v1124_v63 }
 0xa0a   :  { %1128 = vrot.lane.b32.xlu0 %v1126_v0, %s3695_s11 }
 0xa0f   :  { %v1028_v1 = vpop.permute.xlu1 %1027 }
 0xa10   :  { %v1030_v2 = vmul.f32 %v3549_v60, %v1028_v1 }
 0xa12   :  { %1032 = vrot.lane.b32.xlu1 %v1030_v2, %s3695_s11 }
 0xa7c   :  { %v1129_v4 = vpop.permute.xlu0 %1128 }
 0xa7d   :  { %v3955_v5 = vadd.f32 %v1129_v4, %v1121_v3 }
 0xa7f   :  { %3550 = vtanh.f32 %v3955_v5 }
 0xa84   :  { %v1033_v7 = vpop.permute.xlu1 %1032 }
 0xa85   :  { %v3959_v8 = vadd.f32 %v1033_v7, %v1025_v22  ;;  %v195_v22 = vadd.f32 %v3872_v46, %v3771_v20 }
 0xa87   :  { %3552 = vtanh.f32 %v3959_v8 }
 0xa89   :  { %v3551_v10 = vpop.eup %3550 }
 0xa8a   :  { %1134 = vrot.lane.b32.xlu0 %v3551_v10, %s3694_s8 }
 0xa91   :  { %v3553_v13 = vpop.eup %3552 }
 0xa92   :  { %1038 = vrot.lane.b32.xlu1 %v3553_v13, %s3694_s8 }
 0xafc   :  { %v1135_v14 = vpop.permute.xlu0 %1134 }
 0xafd   :  { %v1137_v15 = vmul.f32 %v3547_v57, %v1135_v14 }
 0xaff   :  { %1139 = vrot.lane.b32.xlu0 %v1137_v15, %s3695_s11 }
 0xb04   :  { %v1039_v17 = vpop.permute.xlu1 %1038 }
 0xb05   :  { %v1041_v18 = vmul.f32 %v3549_v60, %v1039_v17 }
 0xb07   :  { %1214 = vrot.lane.b32.xlu1 %v1041_v18, %s3695_s11 }
 0xb71   :  { %v1140_v19 = vpop.permute.xlu0 %1139 }
 0xb72   :  { %3084 = vmatmul.mubr.msk.f32.vlgmr.msra.gmra.mrb[14].mxu0 %vm212_vm2, %v1140_v19  ;;  %3106 = vmatmul.mubr.msk.f32.vlgmr.msra.gmra.mrb[8].mxu1 %vm212_vm2, %v1140_v19 }
 0xb73   :  { %3361 = vmatpush3.bf16.msra.mxu0 %v3797_v51  ;;  %3094 = vmatprep.mubr.msk.f32.mxu0 %vm3692_vm1, %v3693_v12 }
 0xb74   :  { %3362 = vmatprep.subr.bf16.mxu0 %v3691_v9  ;;  %3373 = vmatpush3.bf16.msra.mxu1 %v3787_v43 }
 0xb75   :  { %3374 = vmatprep.subr.bf16.mxu1 %v3691_v9  ;;  %3116 = vmatprep.mubr.msk.f32.mxu1 %vm3692_vm1, %v3693_v12 }
 0xb77   :  { %3364 = vmatpush3.bf16.msra.mxu0 %v3801_v55 }
 0xb78   :  { %3383 = vmatprep.subr.bf16.mxu0 %v3691_v9  ;;  %3376 = vmatpush3.bf16.msra.mxu1 %v3790_v45 }
 0xb79   :  { %v3979_v23 = vpop.permute.xlu1 %1214  ;;  %3377 = vmatprep.subr.bf16.mxu1 %v3691_v9 }
 0xb7a   :  { %3095 = vmatmul.mubr.msk.f32.vlgmr.msra.gmra.mrb[14].mxu0 %vm212_vm2, %v3979_v23 }
 0xb7b   :  { %3385 = vmatpush3.bf16.msra.mxu0 %v3742_v6  ;;  %3138 = vmatprep.mubr.msk.f32.mxu0 %vm3692_vm1, %v3693_v12 }
 0xb7c   :  { %3386 = vmatprep.subr.bf16.mxu0 %v3691_v9 }
 0xb7f   :  { %3388 = vmatpush3.bf16.msra.mxu0 %v3751_v11 }
 0xb80   :  { %3389 = vmatprep.subr.bf16.mxu0 %v3691_v9 }
 0xc45   :  { %v1380_v25 = vpop.f32.mrb[8].mxu1 }
 0xc46   :  { %v1384_v26 = vadd.f32 %v1380_v25, %v190_v24  ;;  %v3107_v27 = vpop.f32.mrb[9].mxu1 }
 0xc48   :  { %v2743_v28 = vmul.f32 -1.442695, %v1384_v26 }
 0xc4a   :  { %3554 = vpow2.f32 %v2743_v28 }
 0xc4d   :  { %v1284_v29 = vpop.f32.mrb[14].mxu0 }
 0xc4e   :  { %v3482_v30 = vadd.f32 %v1284_v29, %v3826_v58  ;;  %v3096_v31 = vpop.f32.mrb[15].mxu0 }
 0xc50   :  { %v2740_v32 = vmul.f32 -1.442695, %v3482_v30 }
 0xc52   :  { %3556 = vpow2.f32 %v2740_v32 }
 0xc54   :  { %v3555_v33 = vpop.eup %3554 }
 0xc55   :  { %v1388_v35 = vadd.f32 1.0, %v3555_v33 }
 0xc57   :  { %3558 = vrcp.f32 %v1388_v35 }
 0xc5c   :  { %v3557_v36 = vpop.eup %3556 }
 0xc5d   :  { %v1292_v37 = vadd.f32 1.0, %v3557_v36 }
 0xc5f   :  { %3560 = vrcp.f32 %v1292_v37 }
 0xc61   :  { %v3559_v38 = vpop.eup %3558 }
 0xc62   :  { %v1391_v39 = vmul.f32 2.0, %v3559_v38  ;;  %v1393_v56 = vmul.f32 %v3559_v38, %v3955_v5 }
 0xc64   :  { %v2744_v47 = vadd.f32 -1.0, %v1391_v39 }
 0xc66   :  { %1395 = vrot.lane.b32.xlu0 %v2744_v47, %s3694_s8 }
 0xc69   :  { %v3561_v40 = vpop.eup %3560 }
 0xc6a   :  { %v1295_v41 = vmul.f32 2.0, %v3561_v40  ;;  %v1297_v21 = vmul.f32 %v3561_v40, %v3959_v8 }
 0xc6c   :  { %v2741_v42 = vadd.f32 -1.0, %v1295_v41 }
 0xc6e   :  { %1299 = vrot.lane.b32.xlu1 %v2741_v42, %s3694_s8 }
 0xcd8   :  { %v1396_v44 = vpop.permute.xlu0 %1395 }
 0xcd9   :  { %v1398_v50 = vmul.f32 %v3559_v38, %v1396_v44 }
 0xcdb   :  { %1400 = vrot.lane.b32.xlu0 %v1398_v50, %s3695_s11 }
 0xce0   :  { %v1300_v53 = vpop.permute.xlu1 %1299 }
 0xce1   :  { %v1302_v54 = vmul.f32 %v3561_v40, %v1300_v53 }
 0xce3   :  { %1304 = vrot.lane.b32.xlu1 %v1302_v54, %s3695_s11 }
 0xd4d   :  { %v1401_v57 = vpop.permute.xlu0 %1400 }
 0xd4e   :  { %v3998_v59 = vadd.f32 %v1401_v57, %v1393_v56 }
 0xd50   :  { %3562 = vtanh.f32 %v3998_v59 }
 0xd55   :  { %v1305_v60 = vpop.permute.xlu1 %1304 }
 0xd56   :  { %v4002_v61 = vadd.f32 %v1305_v60, %v1297_v21  ;;  %v200_v21 = vadd.f32 %v3878_v49, %v3771_v20 }
 0xd58   :  { %3564 = vtanh.f32 %v4002_v61 }
 0xd5a   :  { %v3563_v62 = vpop.eup %3562 }
 0xd5b   :  { %1406 = vrot.lane.b32.xlu0 %v3563_v62, %s3694_s8 }
 0xd62   :  { %v3565_v63 = vpop.eup %3564 }
 0xd63   :  { %1310 = vrot.lane.b32.xlu1 %v3565_v63, %s3694_s8 }
 0xdcd   :  { %v1407_v0 = vpop.permute.xlu0 %1406 }
 0xdce   :  { %v1409_v1 = vmul.f32 %v3559_v38, %v1407_v0 }
 0xdd0   :  { %1411 = vrot.lane.b32.xlu0 %v1409_v1, %s3695_s11 }
 0xdd5   :  { %v1311_v2 = vpop.permute.xlu1 %1310 }
 0xdd6   :  { %v1313_v3 = vmul.f32 %v3561_v40, %v1311_v2 }
 0xdd8   :  { %1486 = vrot.lane.b32.xlu1 %v1313_v3, %s3695_s11 }
 0xe42   :  { %v1412_v4 = vpop.permute.xlu0 %1411 }
 0xe43   :  { %3117 = vmatmul.mubr.msk.f32.vlgmr.msra.gmra.mrb[10].mxu1 %vm212_vm2, %v1412_v4  ;;  %3139 = vmatmul.mubr.msk.f32.vlgmr.msra.gmra.mrb[16].mxu0 %vm212_vm2, %v1412_v4 }
 0xe44   :  { %3379 = vmatpush3.bf16.msra.mxu1 %v3797_v51  ;;  %3127 = vmatprep.mubr.msk.f32.mxu1 %vm3692_vm1, %v3693_v12 }
 0xe45   :  { %3380 = vmatprep.subr.bf16.mxu1 %v3691_v9  ;;  %3391 = vmatpush3.bf16.msra.mxu0 %v3787_v43 }
 0xe46   :  { %3392 = vmatprep.subr.bf16.mxu0 %v3691_v9  ;;  %3149 = vmatprep.mubr.msk.f32.mxu0 %vm3692_vm1, %v3693_v12 }
 0xe48   :  { %3382 = vmatpush3.bf16.msra.mxu1 %v3801_v55 }
 0xe49   :  { %3401 = vmatprep.subr.bf16.mxu1 %v3691_v9  ;;  %3394 = vmatpush3.bf16.msra.mxu0 %v3790_v45 }
 0xe4a   :  { %v4022_v5 = vpop.permute.xlu1 %1486  ;;  %3395 = vmatprep.subr.bf16.mxu0 %v3691_v9 }
 0xe4b   :  { %3128 = vmatmul.mubr.msk.f32.vlgmr.msra.gmra.mrb[10].mxu1 %vm212_vm2, %v4022_v5 }
 0xe4c   :  { %3403 = vmatpush3.bf16.msra.mxu1 %v3742_v6  ;;  %3171 = vmatprep.mubr.msk.f32.mxu1 %vm3692_vm1, %v3693_v12 }
 0xe4d   :  { %3404 = vmatprep.subr.bf16.mxu1 %v3691_v9 }
 0xe50   :  { %3406 = vmatpush3.bf16.msra.mxu1 %v3751_v11 }
 0xe51   :  { %3407 = vmatprep.subr.bf16.mxu1 %v3691_v9 }
 0xf16   :  { %v1652_v7 = vpop.f32.mrb[16].mxu0 }
 0xf17   :  { %v1656_v8 = vadd.f32 %v1652_v7, %v195_v22  ;;  %v3140_v10 = vpop.f32.mrb[17].mxu0 }
 0xf19   :  { %v2750_v13 = vmul.f32 -1.442695, %v1656_v8 }
 0xf1b   :  { %3566 = vpow2.f32 %v2750_v13 }
 0xf1e   :  { %v1556_v14 = vpop.f32.mrb[10].mxu1 }
 0xf1f   :  { %v3483_v15 = vadd.f32 %v1556_v14, %v3826_v58  ;;  %v3129_v17 = vpop.f32.mrb[11].mxu1 }
 0xf21   :  { %v2747_v18 = vmul.f32 -1.442695, %v3483_v15 }
 0xf23   :  { %3568 = vpow2.f32 %v2747_v18 }
 0xf25   :  { %v3567_v19 = vpop.eup %3566 }
 0xf26   :  { %v1660_v24 = vadd.f32 1.0, %v3567_v19 }
 0xf28   :  { %3570 = vrcp.f32 %v1660_v24 }
 0xf2d   :  { %v3569_v25 = vpop.eup %3568 }
 0xf2e   :  { %v1564_v26 = vadd.f32 1.0, %v3569_v25 }
 0xf30   :  { %3572 = vrcp.f32 %v1564_v26 }
 0xf32   :  { %v3571_v27 = vpop.eup %3570 }
 0xf33   :  { %v1663_v28 = vmul.f32 2.0, %v3571_v27  ;;  %v1665_v37 = vmul.f32 %v3571_v27, %v3998_v59 }
 0xf35   :  { %v2751_v46 = vadd.f32 -1.0, %v1663_v28 }
 0xf37   :  { %1667 = vrot.lane.b32.xlu0 %v2751_v46, %s3694_s8 }
 0xf3a   :  { %v3573_v29 = vpop.eup %3572 }
 0xf3b   :  { %v1567_v30 = vmul.f32 2.0, %v3573_v29  ;;  %v1569_v47 = vmul.f32 %v3573_v29, %v4002_v61 }
 0xf3d   :  { %v2748_v31 = vadd.f32 -1.0, %v1567_v30 }
 0xf3f   :  { %1571 = vrot.lane.b32.xlu1 %v2748_v31, %s3694_s8 }
 0xfa9   :  { %v1668_v32 = vpop.permute.xlu0 %1667 }
 0xfaa   :  { %v1670_v33 = vmul.f32 %v3571_v27, %v1668_v32 }
 0xfac   :  { %1672 = vrot.lane.b32.xlu0 %v1670_v33, %s3695_s11 }
 0xfb1   :  { %v1572_v35 = vpop.permute.xlu1 %1571 }
 0xfb2   :  { %v1574_v36 = vmul.f32 %v3573_v29, %v1572_v35 }
 0xfb4   :  { %1576 = vrot.lane.b32.xlu1 %v1574_v36, %s3695_s11 }
0x101e   :  { %v1673_v38 = vpop.permute.xlu0 %1672 }
0x101f   :  { %v4041_v39 = vadd.f32 %v1673_v38, %v1665_v37  ;;  %v44_v37 = vld [vmem:[#allocation2 + $0x78] sm:$0xff]  ;;  %v45_v38 = vld [vmem:[#allocation2 + $0x80] sm:$0xff] }
0x1021   :  { %3574 = vtanh.f32 %v4041_v39 }
0x1026   :  { %v1577_v40 = vpop.permute.xlu1 %1576 }
0x1027   :  { %v4045_v41 = vadd.f32 %v1577_v40, %v1569_v47  ;;  %v46_v47 = vld [vmem:[#allocation2 + $0x88] sm:$0xff]  ;;  %v47_v40 = vld [vmem:[#allocation2 + $0x90] sm:$0xff] }
0x1029   :  { %3576 = vtanh.f32 %v4045_v41 }
0x102b   :  { %v3575_v42 = vpop.eup %3574 }
0x102c   :  { %1678 = vrot.lane.b32.xlu0 %v3575_v42, %s3694_s8 }
0x1033   :  { %v3577_v44 = vpop.eup %3576 }
0x1034   :  { %1582 = vrot.lane.b32.xlu1 %v3577_v44, %s3694_s8 }
0x109e   :  { %v1679_v50 = vpop.permute.xlu0 %1678 }
0x109f   :  { %v1681_v53 = vmul.f32 %v3571_v27, %v1679_v50 }
0x10a1   :  { %1683 = vrot.lane.b32.xlu0 %v1681_v53, %s3695_s11 }
0x10a6   :  { %v1583_v54 = vpop.permute.xlu1 %1582 }
0x10a7   :  { %v1585_v56 = vmul.f32 %v3573_v29, %v1583_v54 }
0x10a9   :  { %1758 = vrot.lane.b32.xlu1 %v1585_v56, %s3695_s11 }
0x1113   :  { %v1684_v57 = vpop.permute.xlu0 %1683 }
0x1114   :  { %3150 = vmatmul.mubr.msk.f32.vlgmr.msra.gmra.mrb[18].mxu0 %vm212_vm2, %v1684_v57  ;;  %3172 = vmatmul.mubr.msk.f32.vlgmr.msra.gmra.mrb[12].mxu1 %vm212_vm2, %v1684_v57 }
0x1115   :  { %3397 = vmatpush3.bf16.msra.mxu0 %v3797_v51  ;;  %3160 = vmatprep.mubr.msk.f32.mxu0 %vm3692_vm1, %v3693_v12 }
0x1116   :  { %3398 = vmatprep.subr.bf16.mxu0 %v3691_v9  ;;  %3409 = vmatpush3.bf16.msra.mxu1 %v3787_v43 }
0x1117   :  { %3410 = vmatprep.subr.bf16.mxu1 %v3691_v9  ;;  %3182 = vmatprep.mubr.msk.f32.mxu1 %vm3692_vm1, %v3693_v12 }
0x1119   :  { %3400 = vmatpush3.bf16.msra.mxu0 %v3801_v55 }
0x111a   :  { %3419 = vmatprep.subr.bf16.mxu0 %v3691_v9  ;;  %3412 = vmatpush3.bf16.msra.mxu1 %v3790_v45 }
0x111b   :  { %v4065_v59 = vpop.permute.xlu1 %1758  ;;  %3413 = vmatprep.subr.bf16.mxu1 %v3691_v9 }
0x111c   :  { %3161 = vmatmul.mubr.msk.f32.vlgmr.msra.gmra.mrb[18].mxu0 %vm212_vm2, %v4065_v59 }
0x111d   :  { %3421 = vmatpush3.bf16.msra.mxu0 %v3742_v6  ;;  %3204 = vmatprep.mubr.msk.f32.mxu0 %vm3692_vm1, %v3693_v12 }
0x111e   :  { %3422 = vmatprep.subr.bf16.mxu0 %v3691_v9 }
0x1121   :  { %3424 = vmatpush3.bf16.msra.mxu0 %v3751_v11 }
0x1122   :  { %3425 = vmatprep.subr.bf16.mxu0 %v3691_v9 }
0x11e7   :  { %v1924_v60 = vpop.f32.mrb[12].mxu1 }
0x11e8   :  { %v1928_v61 = vadd.f32 %v1924_v60, %v200_v21  ;;  %v3173_v62 = vpop.f32.mrb[13].mxu1 }
0x11ea   :  { %v2757_v63 = vmul.f32 -1.442695, %v1928_v61 }
0x11ec   :  { %3578 = vpow2.f32 %v2757_v63 }
0x11ef   :  { %v1828_v0 = vpop.f32.mrb[18].mxu0 }
0x11f0   :  { %v3484_v6 = vadd.f32 %v1828_v0, %v3826_v58  ;;  %v3162_v1 = vpop.f32.mrb[19].mxu0 }
0x11f2   :  { %v2754_v2 = vmul.f32 -1.442695, %v3484_v6 }
0x11f4   :  { %3580 = vpow2.f32 %v2754_v2 }
0x11f6   :  { %v3579_v3 = vpop.eup %3578 }
0x11f7   :  { %v1932_v4 = vadd.f32 1.0, %v3579_v3 }
0x11f9   :  { %3582 = vrcp.f32 %v1932_v4 }
0x11fe   :  { %v3581_v11 = vpop.eup %3580 }
0x11ff   :  { %v1836_v22 = vadd.f32 1.0, %v3581_v11 }
0x1201   :  { %3584 = vrcp.f32 %v1836_v22 }
0x1203   :  { %v3583_v7 = vpop.eup %3582 }
0x1204   :  { %v1935_v8 = vmul.f32 2.0, %v3583_v7  ;;  %v1937_v24 = vmul.f32 %v3583_v7, %v4041_v39  ;;  %v3437_v39 = vpack.c.bf16 %v45_v38, %v44_v37 }
0x1206   :  { %v2758_v49 = vadd.f32 -1.0, %v1935_v8 }
0x1208   :  { %1939 = vrot.lane.b32.xlu0 %v2758_v49, %s3694_s8 }
0x120b   :  { %v3585_v10 = vpop.eup %3584 }
0x120c   :  { %v1839_v13 = vmul.f32 2.0, %v3585_v10  ;;  %v1841_v27 = vmul.f32 %v3585_v10, %v4045_v41  ;;  %v3441_v41 = vpack.c.bf16 %v47_v40, %v46_v47  ;;  %v51_v47 = vld [vmem:[#allocation2 + $0xb0] sm:$0xff] }
0x120e   :  { %v2755_v14 = vadd.f32 -1.0, %v1839_v13 }
0x1210   :  { %1843 = vrot.lane.b32.xlu1 %v2755_v14, %s3694_s8 }
0x127a   :  { %v1940_v15 = vpop.permute.xlu0 %1939 }
0x127b   :  { %v1942_v17 = vmul.f32 %v3583_v7, %v1940_v15 }
0x127d   :  { %1944 = vrot.lane.b32.xlu0 %v1942_v17, %s3695_s11 }
0x1282   :  { %v1844_v18 = vpop.permute.xlu1 %1843 }
0x1283   :  { %v1846_v19 = vmul.f32 %v3585_v10, %v1844_v18 }
0x1285   :  { %1848 = vrot.lane.b32.xlu1 %v1846_v19, %s3695_s11 }
0x12ef   :  { %v1945_v25 = vpop.permute.xlu0 %1944 }
0x12f0   :  { %v4084_v26 = vadd.f32 %v1945_v25, %v1937_v24 }
0x12f2   :  { %3586 = vtanh.f32 %v4084_v26 }
0x12f7   :  { %v1849_v28 = vpop.permute.xlu1 %1848 }
0x12f8   :  { %v4088_v46 = vadd.f32 %v1849_v28, %v1841_v27 }
0x12fa   :  { %3588 = vtanh.f32 %v4088_v46 }
0x12fc   :  { %v3587_v29 = vpop.eup %3586 }
0x12fd   :  { %1950 = vrot.lane.b32.xlu0 %v3587_v29, %s3694_s8 }
0x1304   :  { %v3589_v30 = vpop.eup %3588 }
0x1305   :  { %1854 = vrot.lane.b32.xlu1 %v3589_v30, %s3694_s8 }
0x136f   :  { %v1951_v31 = vpop.permute.xlu0 %1950 }
0x1370   :  { %v1953_v32 = vmul.f32 %v3583_v7, %v1951_v31 }
0x1372   :  { %1955 = vrot.lane.b32.xlu0 %v1953_v32, %s3695_s11 }
0x1377   :  { %v1855_v33 = vpop.permute.xlu1 %1854 }
0x1378   :  { %v1857_v35 = vmul.f32 %v3585_v10, %v1855_v33 }
0x137a   :  { %2030 = vrot.lane.b32.xlu1 %v1857_v35, %s3695_s11 }
0x13e4   :  { %v1956_v36 = vpop.permute.xlu0 %1955 }
0x13e5   :  { %3183 = vmatmul.mubr.msk.f32.vlgmr.msra.gmra.mrb[14].mxu1 %vm212_vm2, %v1956_v36  ;;  %3205 = vmatmul.mubr.msk.f32.vlgmr.msra.gmra.mrb[20].mxu0 %vm212_vm2, %v1956_v36 }
0x13e6   :  { %3415 = vmatpush3.bf16.msra.mxu1 %v3797_v51  ;;  %3193 = vmatprep.mubr.msk.f32.mxu1 %vm3692_vm1, %v3693_v12 }
0x13e7   :  { %3416 = vmatprep.subr.bf16.mxu1 %v3691_v9  ;;  %3427 = vmatpush3.bf16.msra.mxu0 %v3787_v43  ;;  %v205_v43 = vadd.f32 %v3876_v48, %v3771_v20 }
0x13e8   :  { %3428 = vmatprep.subr.bf16.mxu0 %v3691_v9  ;;  %3215 = vmatprep.mubr.msk.f32.mxu0 %vm3692_vm1, %v3693_v12 }
0x13ea   :  { %3418 = vmatpush3.bf16.msra.mxu1 %v3801_v55 }
0x13eb   :  { %3438 = vmatprep.subr.bf16.mxu1 %v3437_v39  ;;  %3430 = vmatpush3.bf16.msra.mxu0 %v3790_v45 }
0x13ec   :  { %v2031_v42 = vpop.permute.xlu1 %2030  ;;  %3431 = vmatprep.subr.bf16.mxu0 %v3691_v9 }
0x13ed   :  { %3194 = vmatmul.mubr.msk.f32.vlgmr.msra.gmra.mrb[14].mxu1 %vm212_vm2, %v2031_v42 }
0x13ee   :  { %3440 = vmatpush3.bf16.msra.mxu1 %v3437_v39  ;;  %3237 = vmatprep.mubr.msk.f32.mxu1 %vm212_vm2, %v3893_v52  ;;  %v50_v39 = vld [vmem:[#allocation2 + $0xa8] sm:$0xff] }
0x13ef   :  { %3442 = vmatprep.subr.bf16.mxu1 %v3441_v41 }
0x13f2   :  { %3444 = vmatpush3.bf16.msra.mxu1 %v3441_v41  ;;  %v52_v41 = vld [vmem:[#allocation2 + $0xb8] sm:$0xff] }
0x13f5   :  { %3238 = vmatmul.mubr.msk.f32.vlgmr.msra.gmra.mrb[16].mxu1 %vm212_vm2, %v3936_v34 }
0x13f6   :  { %3240 = vmatprep.mubr.msk.f32.mxu1 %vm212_vm2, %v3979_v23 }
0x13f9   :  { %3241 = vmatmul.mubr.msk.f32.gmra.mrb[18].mxu1 %vm212_vm2, %v4022_v5 }
0x13fa   :  { %3243 = vmatprep.mubr.msk.f32.mxu1 %vm212_vm2, %v4065_v59 }
0x13fd   :  { %3244 = vmatmul.mubr.msk.f32.gmra.mrb[20].mxu1 %vm212_vm2, %v2031_v42  ;;  %v3449_v42 = vpack.c.bf16 %v52_v41, %v51_v47 }
0x14b8   :  { %v2196_v45 = vpop.f32.mrb[20].mxu0 }
0x14b9   :  { %v2200_v52 = vadd.f32 %v2196_v45, %v205_v43  ;;  %v3206_v44 = vpop.f32.mrb[21].mxu0  ;;  %v53_v43 = vld [vmem:[#allocation2 + $0xc0] sm:$0xff]  ;;  %v54_v45 = vld [vmem:[#allocation2 + $0xc8] sm:$0xff] }
0x14ba   :  { %v55_v44 = vld [vmem:[#allocation2 + $0xd0] sm:$0xff] }
0x14bb   :  { %v2764_v50 = vmul.f32 -1.442695, %v2200_v52  ;;  %v3453_v52 = vpack.c.bf16 %v54_v45, %v53_v43 }
0x14bd   :  { %3590 = vpow2.f32 %v2764_v50  ;;  %v56_v50 = vld [vmem:[#allocation2 + $0xd8] sm:$0xff] }
0x14c0   :  { %v2100_v34 = vpop.f32.mrb[14].mxu1 }
0x14c1   :  { %v3485_v53 = vadd.f32 %v2100_v34, %v3826_v58  ;;  %v3195_v23 = vpop.f32.mrb[15].mxu1  ;;  %v3457_v34 = vpack.c.bf16 %v56_v50, %v55_v44 }
0x14c2   :  { %v57_v23 = vld [vmem:[#allocation2 + $0xe0] sm:$0xff] }
0x14c3   :  { %v2761_v54 = vmul.f32 -1.442695, %v3485_v53 }
0x14c5   :  { %3592 = vpow2.f32 %v2761_v54  ;;  %v58_v54 = vld [vmem:[#allocation2 + $0xe8] sm:$0xff] }
0x14c7   :  { %v3591_v5 = vpop.eup %3590 }
0x14c8   :  { %v2204_v56 = vadd.f32 1.0, %v3591_v5  ;;  %v4123_v57 = vpop.f32.mrb[16].mxu1  ;;  %v3461_v5 = vpack.c.bf16 %v58_v54, %v57_v23 }
0x14c9   :  { %v4125_v59 = vpop.f32.mrb[17].mxu1 }
0x14ca   :  { %3594 = vrcp.f32 %v2204_v56  ;;  %v59_v56 = vld [vmem:[#allocation2 + $0xf0] sm:$0xff] }
0x14cc   :  { %v4127_v21 = vpop.f32.mrb[18].mxu1 }
0x14cd   :  { %v4129_v20 = vpop.f32.mrb[19].mxu1 }
0x14cf   :  { %v3593_v48 = vpop.eup %3592 }
0x14d0   :  { %v2108_v60 = vadd.f32 1.0, %v3593_v48  ;;  %v4131_v61 = vpop.f32.mrb[20].mxu1  ;;  %v60_v48 = vld [vmem:[#allocation2 + $0xf8] sm:$0xff] }
0x14d1   :  { %v4133_v62 = vpop.f32.mrb[21].mxu1 }
0x14d2   :  { %3596 = vrcp.f32 %v2108_v60  ;;  %v3465_v60 = vpack.c.bf16 %v60_v48, %v59_v56 }
0x14d4   :  { %v3595_v63 = vpop.eup %3594 }
0x14d5   :  { %v2207_v0 = vmul.f32 2.0, %v3595_v63  ;;  %v2209_v8 = vmul.f32 %v3595_v63, %v4084_v26 }
0x14d7   :  { %v2765_v6 = vadd.f32 -1.0, %v2207_v0  ;;  %v62_v0 = vld [vmem:[#allocation2 + $0x108] sm:$0xff] }
0x14d9   :  { %2211 = vrot.lane.b32.xlu0 %v2765_v6, %s3694_s8 }
0x14dc   :  { %v3597_v1 = vpop.eup %3596 }
0x14dd   :  { %v2111_v2 = vmul.f32 2.0, %v3597_v1  ;;  %v2113_v13 = vmul.f32 %v3597_v1, %v4088_v46 }
0x14df   :  { %v2762_v3 = vadd.f32 -1.0, %v2111_v2  ;;  %v64_v2 = vld [vmem:[#allocation2 + $0x118] sm:$0xff] }
0x14e1   :  { %2115 = vrot.lane.b32.xlu1 %v2762_v3, %s3694_s8 }
0x154b   :  { %v2212_v4 = vpop.permute.xlu0 %2211 }
0x154c   :  { %v2214_v11 = vmul.f32 %v3595_v63, %v2212_v4 }
0x154e   :  { %2216 = vrot.lane.b32.xlu0 %v2214_v11, %s3695_s11 }
0x1553   :  { %v2116_v22 = vpop.permute.xlu1 %2115 }
0x1554   :  { %v2118_v7 = vmul.f32 %v3597_v1, %v2116_v22  ;;  %v48_v22 = vld [vmem:[#allocation2 + $0x98] sm:$0xff] }
0x1556   :  { %2120 = vrot.lane.b32.xlu1 %v2118_v7, %s3695_s11  ;;  %v2405_v7 = vrot.slane %v48_v22, %v3766_v16 }
0x15c0   :  { %v2217_v49 = vpop.permute.xlu0 %2216 }
0x15c1   :  { %v2219_v10 = vadd.f32 %v2217_v49, %v2209_v8  ;;  %v2478_v8 = vadd.f32 %v4125_v59, %v2405_v7  ;;  %v2483_v49 = vadd.f32 %v4123_v57, %v2405_v7  ;;  %v2503_v59 = vadd.f32 %v4131_v61, %v2405_v7 }
0x15c3   :  { %3598 = vtanh.f32 %v2219_v10  ;;  %v2516_v10 = vmax.f32 %v2478_v8, 0.0  ;;  %v2521_v57 = vmax.f32 %v2503_v59, 0.0 }
0x15c8   :  { %v2121_v14 = vpop.permute.xlu1 %2120 }
0x15c9   :  { %v2123_v15 = vadd.f32 %v2121_v14, %v2113_v13  ;;  %v2488_v13 = vadd.f32 %v4129_v20, %v2405_v7  ;;  %v65_v20 = vld [vmem:[#allocation2 + $0x120] sm:$0xff] }
0x15cb   :  { %3600 = vtanh.f32 %v2123_v15 }
0x15cd   :  { %v3599_v17 = vpop.eup %3598 }
0x15ce   :  { %2222 = vrot.lane.b32.xlu0 %v3599_v17, %s3694_s8  ;;  %v2493_v17 = vadd.f32 %v4127_v21, %v2405_v7 }
0x15d5   :  { %v3601_v18 = vpop.eup %3600 }
0x15d6   :  { %2126 = vrot.lane.b32.xlu1 %v3601_v18, %s3694_s8  ;;  %v2518_v18 = vmax.f32 %v2488_v13, 0.0 }
0x1640   :  { %v2223_v19 = vpop.permute.xlu0 %2222 }
0x1641   :  { %v2225_v24 = vmul.f32 %v3595_v63, %v2223_v19  ;;  %v61_v63 = vld [vmem:[#allocation2 + $0x100] sm:$0xff]  ;;  %v2498_v19 = vadd.f32 %v4133_v62, %v2405_v7 }
0x1642   :  { %v3469_v6 = vpack.c.bf16 %v62_v0, %v61_v63 }
0x1643   :  { %2227 = vrot.lane.b32.xlu0 %v2225_v24, %s3695_s11  ;;  %v2519_v24 = vmax.f32 %v2493_v17, 0.0 }
0x1648   :  { %v2127_v25 = vpop.permute.xlu1 %2126 }
0x1649   :  { %v2129_v26 = vmul.f32 %v3597_v1, %v2127_v25  ;;  %v63_v1 = vld [vmem:[#allocation2 + $0x110] sm:$0xff]  ;;  %v2520_v25 = vmax.f32 %v2498_v19, 0.0 }
0x164a   :  { %v3473_v3 = vpack.c.bf16 %v64_v2, %v63_v1 }
0x164b   :  { %2302 = vrot.lane.b32.xlu1 %v2129_v26, %s3695_s11 }
0x16b5   :  { %v2228_v27 = vpop.permute.xlu0 %2227 }
0x16b6   :  { %3216 = vmatmul.mubr.msk.f32.vlgmr.msra.gmra.mrb[22].mxu0 %vm212_vm2, %v2228_v27 }
0x16b7   :  { %3433 = vmatpush3.bf16.msra.mxu0 %v3797_v51  ;;  %3226 = vmatprep.mubr.msk.f32.mxu0 %vm3692_vm1, %v3693_v12 }
0x16b8   :  { %3434 = vmatprep.subr.bf16.mxu0 %v3691_v9 }
0x16bb   :  { %3436 = vmatpush3.bf16.msra.mxu0 %v3801_v55 }
0x16bd   :  { %v2303_v28 = vpop.permute.xlu1 %2302 }
0x16be   :  { %3227 = vmatmul.mubr.msk.f32.vlgmr.msra.gmra.mrb[22].mxu0 %vm212_vm2, %v2303_v28  ;;  %3246 = vmatprep.mubr.msk.f32.mxu1 %vm212_vm2, %v2303_v28 }
0x1791   :  { %v2372_v46 = vpop.f32.mrb[22].mxu0 }
0x1792   :  { %v3486_v29 = vadd.f32 %v2372_v46, %v3826_v58  ;;  %v3228_v30 = vpop.f32.mrb[23].mxu0  ;;  %v49_v58 = vld [vmem:[#allocation2 + $0xa0] sm:$0xff]  ;;  %v4167_v46 = vrot.slane %v65_v20, %v3766_v16 }
0x1793   :  { %v3445_v40 = vpack.c.bf16 %v50_v39, %v49_v58 }
0x1794   :  { %v2768_v31 = vmul.f32 -1.442695, %v3486_v29 }
0x1795   :  { %3446 = vmatprep.subr.bf16.mxu1 %v3445_v40 }
0x1796   :  { %3602 = vpow2.f32 %v2768_v31  ;;  %3448 = vmatpush3.bf16.msra.mxu1 %v3445_v40 }
0x1797   :  { %3450 = vmatprep.subr.bf16.mxu1 %v3449_v42 }
0x179a   :  { %3452 = vmatpush3.bf16.msra.mxu1 %v3449_v42 }
0x179b   :  { %3454 = vmatprep.subr.bf16.mxu1 %v3453_v52 }
0x179e   :  { %3456 = vmatpush3.bf16.msra.mxu1 %v3453_v52 }
0x179f   :  { %3458 = vmatprep.subr.bf16.mxu1 %v3457_v34 }
0x17a0   :  { %v3603_v32 = vpop.eup %3602 }
0x17a1   :  { %v2380_v51 = vadd.f32 1.0, %v3603_v32 }
0x17a2   :  { %3460 = vmatpush3.bf16.msra.mxu1 %v3457_v34 }
0x17a3   :  { %3604 = vrcp.f32 %v2380_v51  ;;  %3462 = vmatprep.subr.bf16.mxu1 %v3461_v5 }
0x17a6   :  { %3464 = vmatpush3.bf16.msra.mxu1 %v3461_v5 }
0x17a7   :  { %3466 = vmatprep.subr.bf16.mxu1 %v3465_v60 }
0x17aa   :  { %3468 = vmatpush3.bf16.msra.mxu1 %v3465_v60 }
0x17ab   :  { %3470 = vmatprep.subr.bf16.mxu1 %v3469_v6 }
0x17ad   :  { %v3605_v33 = vpop.eup %3604 }
0x17ae   :  { %v2383_v12 = vmul.f32 2.0, %v3605_v33  ;;  %v2385_v36 = vmul.f32 %v3605_v33, %v2123_v15  ;;  %3472 = vmatpush3.bf16.msra.mxu1 %v3469_v6  ;;  %v2517_v15 = vmax.f32 %v2483_v49, 0.0 }
0x17af   :  { %3474 = vmatprep.subr.bf16.mxu1 %v3473_v3 }
0x17b0   :  { %v2769_v35 = vadd.f32 -1.0, %v2383_v12 }
0x17b2   :  { %2387 = vrot.lane.b32.xlu0 %v2769_v35, %s3694_s8  ;;  %3476 = vmatpush3.bf16.msra.mxu1 %v3473_v3 }
0x1824   :  { %v2388_v9 = vpop.permute.xlu0 %2387 }
0x1825   :  { %v2390_v55 = vmul.f32 %v3605_v33, %v2388_v9 }
0x1827   :  { %2392 = vrot.lane.b32.xlu1 %v2390_v55, %s3695_s11 }
0x1899   :  { %v2393_v37 = vpop.permute.xlu1 %2392 }
0x189a   :  { %v2395_v38 = vadd.f32 %v2393_v37, %v2385_v36 }
0x189c   :  { %3606 = vtanh.f32 %v2395_v38 }
0x18a6   :  { %v3607_v53 = vpop.eup %3606 }
0x18a7   :  { %2398 = vrot.lane.b32.xlu0 %v3607_v53, %s3694_s8 }
0x1919   :  { %v2399_v4 = vpop.permute.xlu0 %2398 }
0x191a   :  { %v2401_v11 = vmul.f32 %v3605_v33, %v2399_v4 }
0x191c   :  { %2407 = vrot.lane.b32.xlu1 %v2401_v11, %s3695_s11 }
0x198e   :  { %v2408_v14 = vpop.permute.xlu1 %2407 }
0x198f   :  { %3247 = vmatmul.mubr.msk.f32.gmra.mrb[22].mxu1 %vm212_vm2, %v2408_v14 }
0x1990   :  { %3281 = vmatprep.mubr.f32.mxu1 %v2516_v10 }
0x1993   :  { %3282 = vmatmul.mubr.f32.vlgmr.msra.gmra.mrb[24].mxu1 %v2517_v15 }
0x1994   :  { %3284 = vmatprep.mubr.f32.mxu1 %v2518_v18 }
0x1997   :  { %3285 = vmatmul.mubr.f32.gmra.mrb[26].mxu1 %v2519_v24 }
0x1998   :  { %3287 = vmatprep.mubr.f32.mxu1 %v2520_v25 }
0x199b   :  { %3288 = vmatmul.mubr.f32.gmra.mrb[28].mxu1 %v2521_v57 }
0x1a62   :  { %v3248_v26 = vpop.f32.mrb[22].mxu1 }
0x1a63   :  { %v2513_v27 = vadd.f32 %v3248_v26, %v2405_v7  ;;  %v2507_v28 = vpop.f32.mrb[23].mxu1 }
0x1a64   :  { %v2508_v21 = vadd.f32 %v2507_v28, %v2405_v7 }
0x1a65   :  { %v2523_v30 = vmax.f32 %v2513_v27, 0.0 }
0x1a66   :  { %v2522_v29 = vmax.f32 %v2508_v21, 0.0  ;;  %v3283_v62 = vpop.f32.mrb[24].mxu1 }
0x1a67   :  { %v2600_v31 = vadd.f32 %v3283_v62, %v4167_v46  ;;  %v2594_v32 = vpop.f32.mrb[25].mxu1 }
0x1a68   :  { %v2595_v61 = vadd.f32 %v2594_v32, %v4167_v46  ;;  %3290 = vmatprep.mubr.f32.mxu1 %v2522_v29 }
0x1a69   :  { %v2779_v51 = vmul.f32 -1.442695, %v2600_v31  ;;  %3291 = vmatmul.mubr.f32.gmra.mrb[30].mxu1 %v2523_v30 }
0x1a6a   :  { %v2778_v33 = vmul.f32 -1.442695, %v2595_v61  ;;  %v3286_v12 = vpop.f32.mrb[26].mxu1 }
0x1a6b   :  { %3608 = vpow2.f32 %v2779_v51  ;;  %v2610_v35 = vadd.f32 %v3286_v12, %v4167_v46  ;;  %v2604_v9 = vpop.f32.mrb[27].mxu1 }
0x1a6c   :  { %3610 = vpow2.f32 %v2778_v33  ;;  %v2605_v16 = vadd.f32 %v2604_v9, %v4167_v46 }
0x1a6d   :  { %v2781_v55 = vmul.f32 -1.442695, %v2610_v35 }
0x1a6e   :  { %v2780_v36 = vmul.f32 -1.442695, %v2605_v16  ;;  %v3289_v37 = vpop.f32.mrb[28].mxu1 }
0x1a6f   :  { %3612 = vpow2.f32 %v2781_v55  ;;  %v2620_v38 = vadd.f32 %v3289_v37, %v4167_v46  ;;  %v2614_v58 = vpop.f32.mrb[29].mxu1 }
0x1a70   :  { %3614 = vpow2.f32 %v2780_v36  ;;  %v2615_v39 = vadd.f32 %v2614_v58, %v4167_v46 }
0x1a71   :  { %v2783_v47 = vmul.f32 -1.442695, %v2620_v38 }
0x1a72   :  { %v2782_v40 = vmul.f32 -1.442695, %v2615_v39 }
0x1a73   :  { %3616 = vpow2.f32 %v2783_v47 }
0x1a74   :  { %3618 = vpow2.f32 %v2782_v40 }
0x1a75   :  { %v3609_v41 = vpop.eup %3608 }
0x1a76   :  { %v3611_v42 = vpop.eup %3610  ;;  %v2658_v43 = vadd.f32 1.0, %v3609_v41 }
0x1a77   :  { %v2657_v45 = vadd.f32 1.0, %v3611_v42 }
0x1a78   :  { %3620 = vrcp.f32 %v2658_v43 }
0x1a79   :  { %v3613_v52 = vpop.eup %3612  ;;  %3622 = vrcp.f32 %v2657_v45 }
0x1a7a   :  { %v3615_v44 = vpop.eup %3614  ;;  %v2660_v50 = vadd.f32 1.0, %v3613_v52 }
0x1a7b   :  { %v2659_v34 = vadd.f32 1.0, %v3615_v44 }
0x1a7c   :  { %3624 = vrcp.f32 %v2660_v50 }
0x1a7d   :  { %v3617_v53 = vpop.eup %3616  ;;  %3626 = vrcp.f32 %v2659_v34 }
0x1a7e   :  { %v3619_v23 = vpop.eup %3618  ;;  %v2662_v54 = vadd.f32 1.0, %v3617_v53 }
0x1a7f   :  { %v2661_v5 = vadd.f32 1.0, %v3619_v23 }
0x1a80   :  { %3628 = vrcp.f32 %v2662_v54 }
0x1a81   :  { %3630 = vrcp.f32 %v2661_v5 }
0x1a82   :  { %v3621_v56 = vpop.eup %3620 }
0x1a83   :  { %v3623_v48 = vpop.eup %3622  ;;  %2682 = vst [vmem:[#allocation5 + $0x8] sm:$0xff] %v3621_v56 }
0x1a84   :  { %2681 = vst [vmem:[#allocation5] sm:$0xff] %v3623_v48 }
0x1a86   :  { %v3625_v60 = vpop.eup %3624 }
0x1a87   :  { %v3627_v63 = vpop.eup %3626  ;;  %2684 = vst [vmem:[#allocation5 + $0x18] sm:$0xff] %v3625_v60 }
0x1a88   :  { %2683 = vst [vmem:[#allocation5 + $0x10] sm:$0xff] %v3627_v63 }
0x1a8a   :  { %v3629_v0 = vpop.eup %3628 }
0x1a8b   :  { %v3631_v6 = vpop.eup %3630  ;;  %2686 = vst [vmem:[#allocation5 + $0x28] sm:$0xff] %v3629_v0 }
0x1a8c   :  { %2685 = vst [vmem:[#allocation5 + $0x20] sm:$0xff] %v3631_v6 }
0x1b3c   :  { %v3292_v1 = vpop.f32.mrb[30].mxu1 }
0x1b3d   :  { %v2630_v2 = vadd.f32 %v3292_v1, %v4167_v46  ;;  %v2624_v3 = vpop.f32.mrb[31].mxu1 }
0x1b3e   :  { %v2625_v4 = vadd.f32 %v2624_v3, %v4167_v46 }
0x1b3f   :  { %v2785_v11 = vmul.f32 -1.442695, %v2630_v2 }
0x1b40   :  { %v2784_v22 = vmul.f32 -1.442695, %v2625_v4 }
0x1b41   :  { %3632 = vpow2.f32 %v2785_v11 }
0x1b42   :  { %3634 = vpow2.f32 %v2784_v22 }
0x1b4b   :  { %v3633_v7 = vpop.eup %3632 }
0x1b4c   :  { %v3635_v8 = vpop.eup %3634  ;;  %v2664_v49 = vadd.f32 1.0, %v3633_v7 }
0x1b4d   :  { %v2663_v10 = vadd.f32 1.0, %v3635_v8 }
0x1b4e   :  { %3636 = vrcp.f32 %v2664_v49 }
0x1b4f   :  { %3638 = vrcp.f32 %v2663_v10 }
0x1b58   :  { %v3637_v13 = vpop.eup %3636 }
0x1b59   :  { %v3639_v14 = vpop.eup %3638  ;;  %2688 = vst [vmem:[#allocation5 + $0x38] sm:$0xff] %v3637_v13 }
0x1b5a   :  { %2687 = vst [vmem:[#allocation5 + $0x30] sm:$0xff] %v3639_v14 }
0x1b5b   :  { %3673 = shalt.err (!%p3670_p12)
}
0x1b5c   :  { %s3674_s29 = scalar_lea.hbm %s4195_s3, 1024 }
0x1b5d   :  { %p3675_p13 = scmp.ne.s32.totalorder %s4195_s3, %s3674_s29  ;;  %p3678_p0 = scmp.lt.u32.totalorder %s3674_s29, %s4195_s3 }
0x1b5f   :  { %p3680_p1 = pnand %p3678_p0, %p3675_p13 }
0x1b61   :  { %3683 = shalt.err (!%p3680_p1)
}
0x1b62   :  { %2700 = dma.vmem_to_hbm [thread:$0]  %s2695_s25, 1024, %s4195_s3, [#allocation4], %s3689_s22, %s3689_s22, %s3690_s23  }
0x1b63   :  { %3686 = dma.done.wait [#allocation4], 1024  }
0x1b64   :  { %3687 = vsyncadd [#allocation4], 4294966272 }
0x1b65   :  { %2704 = vsyncpa [#allocation3], 1 }
0x1b66   :  { %2705 = vsyncpa [#allocation4], 1 }

</bundles_post_ra>
